<compile_context>
chip_gen: v6e
topology: v6e:2x2x1
jax: 0.10.0
libtpu: 0.0.40
codegen_flags: <defaults>
</compile_context>

<pallas_src>
import math
from functools import lru_cache

import numpy as np

import jax
import jax.numpy as jnp
from jax.experimental import pallas as pl
from jax.experimental.pallas import tpu as pltpu


# -----------------------------------------------------------------------------
# Fused Pallas kernel (one grid step == one batch element)
# -----------------------------------------------------------------------------

def _make_fused_kernel(*, W, HW, has_context):
    TAPS = [(dy, dx) for dy in (-1, 0, 1) for dx in (-1, 0, 1)]

    def kernel(*refs):
        if has_context:
            (x_ref, mask_ref, be_ref, win_ref, wout_ref, bout_ref,
             ctx_ref, wqt_ref, wk_ref, wvt_ref, wot_ref, o_ref) = refs
        else:
            (x_ref, mask_ref, be_ref, win_ref, wout_ref, bout_ref,
             o_ref) = refs

        masks = mask_ref[...]                                 # (9, HW) f32

        def tap_shift(z, ti):
            # z'[:, q] = z[:, q + off] with zeros outside the image.
            dy, dx = TAPS[ti]
            off = dy * W + dx
            if off == 0:
                return z
            s = pltpu.roll(z, shift=(-off) % HW, axis=1)      # XLU lane rotate
            return s * masks[ti:ti + 1, :]                    # zero OOB taps

        # ---- stage 1: conv_in as one K-packed (D, 9*Cin) @ (9*Cin, HW) ------
        x = x_ref[...]                                        # (Cin, HW) f32
        patches = jnp.concatenate(
            [tap_shift(x, ti) for ti in range(9)], axis=0
        ).astype(jnp.bfloat16)                                # (9*Cin, HW)
        h = jnp.dot(win_ref[...], patches,
                    preferred_element_type=jnp.float32)       # (D, HW) f32

        # ---- stage 2: +(bias+temb), SiLU, optional cross-attention ----------
        h = h + be_ref[...]                                   # (D, HW)+(D, 1)
        h = h * jax.nn.sigmoid(h)                             # SiLU (f32)
        if has_context:
            h16 = h.astype(jnp.bfloat16)
            ctx = ctx_ref[...]                                # (S, Cc) bf16
            # qT = (scale*Wq)^T @ h : (Dh, HW)   (scale folded into Wq)
            qT = jnp.dot(wqt_ref[...], h16,
                         preferred_element_type=jnp.float32)
            # k = ctx @ Wk : (S, Dh)
            k = jnp.dot(ctx, wk_ref[...],
                        preferred_element_type=jnp.float32)
            # vT = Wv^T @ ctx^T : (Dh, S)
            vT = jax.lax.dot_general(
                wvt_ref[...], ctx, (((1,), (1,)), ((), ())),
                preferred_element_type=jnp.float32)
            # sT = k @ qT : (S, HW)
            sT = jnp.dot(k.astype(jnp.bfloat16), qT.astype(jnp.bfloat16),
                         preferred_element_type=jnp.float32)
            # softmax over S (sublane axis), f32
            m = jnp.max(sT, axis=0, keepdims=True)
            pT = jnp.exp(sT - m)
            inv = pl.reciprocal(jnp.sum(pT, axis=0, keepdims=True),
                                approx=True)
            pT = (pT * inv).astype(jnp.bfloat16)              # (S, HW)
            # attnT = vT @ pT : (Dh, HW);  out = Wo^T @ attnT : (D, HW)
            attnT = jnp.dot(vT.astype(jnp.bfloat16), pT,
                            preferred_element_type=jnp.float32)
            h = h + jnp.dot(wot_ref[...], attnT.astype(jnp.bfloat16),
                            preferred_element_type=jnp.float32)   # residual

        # ---- stage 3: conv_out as 9-tap accumulation (no 9x patch matrix) ---
        acc = None
        for ti in range(9):
            s = tap_shift(h, ti).astype(jnp.bfloat16)         # (D, HW)
            contrib = jnp.dot(wout_ref[ti], s,
                              preferred_element_type=jnp.float32)  # (Cout, HW)
            acc = contrib if acc is None else acc + contrib
        # lane-dense, already NCHW-ordered (Cout, HW) store for this batch.
        o_ref[...] = (acc + bout_ref[...]).astype(o_ref.dtype)

    return kernel


# -----------------------------------------------------------------------------
# Wrapper: glue in plain JAX, single fused pallas_call with batch on the grid
# -----------------------------------------------------------------------------

def _silu(x):
    return x * jax.nn.sigmoid(x)


def timestep_embedding(t, dim):
    half = dim // 2
    freqs = jnp.exp(-math.log(10000.0)
                    * jnp.arange(half, dtype=jnp.float32) / half)
    args = t.astype(jnp.float32)[:, None] * freqs[None, :]
    return jnp.concatenate([jnp.cos(args), jnp.sin(args)], axis=-1)


@lru_cache(maxsize=None)
def _tap_masks(H, W):
    """Per-tap validity masks for implicit 'SAME' zero padding: (9, H*W) f32."""
    HW = H * W
    qi = np.arange(HW)
    yv = qi // W
    xv = qi % W
    rows = []
    for dy in (-1, 0, 1):
        for dx in (-1, 0, 1):
            rows.append((yv + dy >= 0) & (yv + dy < H)
                        & (xv + dx >= 0) & (xv + dx < W))
    return jnp.asarray(np.stack(rows, axis=0).astype(np.float32))


def fused_diffusion_forward(kp, x_nchw, t, context=None, y=None):
    x_nchw = x_nchw.astype(jnp.float32)
    B, Cin, H, W = x_nchw.shape
    HW = H * W
    Cout = kp["out_ch"]

    # timestep-embedding MLP (+ optional adm class/vector conditioning) — tiny
    temb = timestep_embedding(t, kp["temb_dim"])
    emb = _silu(temb @ kp["wt1"] + kp["bt1"]) @ kp["wt2"] + kp["bt2"]   # (B, D)
    if y is not None:
        emb = emb + y.astype(jnp.float32) @ kp["wy"] + kp["by"]
    be = (emb + kp["b_in"][None, :])[:, :, None]                        # (B,D,1)

    x_flat = x_nchw.reshape(B, Cin, HW)        # free reshape of NCHW, no relayout
    masks = _tap_masks(H, W)                   # (9, HW), cached per (H, W)

    has_context = context is not None
    kernel = _make_fused_kernel(W=W, HW=HW, has_context=has_context)

    def batch_spec(shape):
        nrest = len(shape) - 1
        return pl.BlockSpec((None,) + tuple(shape[1:]),
                            lambda b, _n=nrest: (b,) + (0,) * _n)

    def const_spec(shape):
        ndim = len(shape)
        return pl.BlockSpec(tuple(shape), lambda b, _n=ndim: (0,) * _n)

    inputs = [x_flat, masks, be, kp["win_t"], kp["wout_taps"], kp["b_out_col"]]
    in_specs = [batch_spec(x_flat.shape), const_spec(masks.shape),
                batch_spec(be.shape), const_spec(kp["win_t"].shape),
                const_spec(kp["wout_taps"].shape),
                const_spec(kp["b_out_col"].shape)]
    if has_context:
        ctx_bf = context.astype(jnp.bfloat16)        # halve context DMA
        inputs += [ctx_bf, kp["wq_t"], kp["wk"], kp["wv_t"], kp["wo_t"]]
        in_specs += [batch_spec(ctx_bf.shape),
                     const_spec(kp["wq_t"].shape), const_spec(kp["wk"].shape),
                     const_spec(kp["wv_t"].shape), const_spec(kp["wo_t"].shape)]

    out = pl.pallas_call(
        kernel,
        out_shape=jax.ShapeDtypeStruct((B, Cout, HW), jnp.float32),
        grid=(B,),
        in_specs=in_specs,
        out_specs=pl.BlockSpec((None, Cout, HW), lambda b: (b, 0, 0)),
        compiler_params=pltpu.CompilerParams(
            dimension_semantics=("parallel",)),
    )(*inputs)
    return out.reshape(B, Cout, H, W)                                   # NCHW


# -----------------------------------------------------------------------------
# Parameter init + one-time kernel-layout preprocessing
# -----------------------------------------------------------------------------

def init_params(key, in_ch, out_ch, hidden, temb_dim, ctx_dim, adm_dim):
    ks = jax.random.split(key, 10)

    def nrm(k, shape, fan_in):
        return jax.random.normal(k, shape, jnp.float32) / math.sqrt(fan_in)

    return dict(
        temb_dim=temb_dim,
        wt1=nrm(ks[0], (temb_dim, hidden), temb_dim),
        bt1=jnp.zeros((hidden,), jnp.float32),
        wt2=nrm(ks[1], (hidden, hidden), hidden),
        bt2=jnp.zeros((hidden,), jnp.float32),
        wy=nrm(ks[2], (adm_dim, hidden), adm_dim),
        by=jnp.zeros((hidden,), jnp.float32),
        w_in=nrm(ks[3], (3, 3, in_ch, hidden), 9 * in_ch),
        b_in=jnp.zeros((hidden,), jnp.float32),
        wq=nrm(ks[4], (hidden, hidden), hidden),
        wk=nrm(ks[5], (ctx_dim, hidden), ctx_dim),
        wv=nrm(ks[6], (ctx_dim, hidden), ctx_dim),
        wo=nrm(ks[7], (hidden, hidden), hidden),
        w_out=nrm(ks[8], (3, 3, hidden, out_ch), 9 * hidden),
        b_out=jnp.zeros((out_ch,), jnp.float32),
        scale=1.0 / math.sqrt(hidden),
    )


def prepare_kernel_params(params):
    """One-time layout/dtype transforms for the fused kernel (bf16 MXU ops)."""
    bf = jnp.bfloat16
    hidden = params["wq"].shape[0]
    in_ch = params["w_in"].shape[2]
    out_ch = params["w_out"].shape[3]
    return dict(
        temb_dim=params["temb_dim"], out_ch=out_ch,
        wt1=params["wt1"], bt1=params["bt1"],
        wt2=params["wt2"], bt2=params["bt2"],
        wy=params["wy"], by=params["by"],
        b_in=params["b_in"],                                   # (D,)     f32
        b_out_col=params["b_out"].reshape(out_ch, 1),          # (Cout,1) f32
        # conv_in flattened to K-packed channel-major matmul form (bf16)
        win_t=params["w_in"].reshape(9 * in_ch, hidden).T.astype(bf),
        # conv_out as 9 per-tap (Cout, D) weights for the accumulation loop
        wout_taps=jnp.transpose(params["w_out"].reshape(9, hidden, out_ch),
                                (0, 2, 1)).astype(bf),         # (9, Cout, D)
        # attention weights: scale folded into Wq once; pre-transposed so all
        # in-kernel contractions are plain / rhs-transposed matmuls
        wq_t=(params["wq"] * params["scale"]).T.astype(bf),    # (Dh, D)
        wk=params["wk"].astype(bf),                            # (Cc, Dh)
        wv_t=params["wv"].T.astype(bf),                        # (Dh, Cc)
        wo_t=params["wo"].T.astype(bf),                        # (D, Dh)
    )


# -----------------------------------------------------------------------------
# DiffusionWrapper — mirrors the PyTorch conditioning dispatch exactly
# -----------------------------------------------------------------------------

class DiffusionWrapperPallas:
    def __init__(self, params, conditioning_key):
        assert conditioning_key in [None, "concat", "crossattn", "hybrid",
                                    "adm"]
        self.params = params
        self.kparams = prepare_kernel_params(params)
        self.conditioning_key = conditioning_key

    def __call__(self, x, t, c_concat=None, c_crossattn=None):
        key = self.conditioning_key
        if key is None:
            return fused_diffusion_forward(self.kparams, x, t)
        elif key == "concat":
            xc = jnp.concatenate([x] + list(c_concat), axis=1)
            return fused_diffusion_forward(self.kparams, xc, t)
        elif key == "crossattn":
            cc = jnp.concatenate(list(c_crossattn), axis=1)
            return fused_diffusion_forward(self.kparams, x, t, context=cc)
        elif key == "hybrid":
            xc = jnp.concatenate([x] + list(c_concat), axis=1)
            cc = jnp.concatenate(list(c_crossattn), axis=1)
            return fused_diffusion_forward(self.kparams, xc, t, context=cc)
        elif key == "adm":
            cc = c_crossattn[0]
            return fused_diffusion_forward(self.kparams, x, t, y=cc)
        else:
            raise NotImplementedError()


# -----------------------------------------------------------------------------
# Pure-JAX f32 reference
# -----------------------------------------------------------------------------

def _ref_conv3x3(x, w, b):
    return jax.lax.conv_general_dilated(
        x, w, (1, 1), "SAME",
        dimension_numbers=("NHWC", "HWIO", "NHWC")) + b


def ref_diffusion_model(params, x_nchw, t, context=None, y=None):
    x = jnp.transpose(x_nchw, (0, 2, 3, 1)).astype(jnp.float32)
    temb = timestep_embedding(t, params["temb_dim"])
    emb = _silu(temb @ params["wt1"] + params["bt1"]) @ params["wt2"] \
        + params["bt2"]
    if y is not None:
        emb = emb + y.astype(jnp.float32) @ params["wy"] + params["by"]
    h = _ref_conv3x3(x, params["w_in"], params["b_in"])
    h = _silu(h + emb[:, None, None, :])
    if context is not None:
        B, H, W, D = h.shape
        hf = h.reshape(B, H * W, D)
        q = hf @ params["wq"]
        k = context @ params["wk"]
        v = context @ params["wv"]
        s = jnp.einsum("bqd,bkd->bqk", q, k) * params["scale"]
        p = jax.nn.softmax(s, axis=-1)
        hf = hf + jnp.einsum("bqk,bkd->bqd", p, v) @ params["wo"]
        h = hf.reshape(B, H, W, D)
    out = _ref_conv3x3(h, params["w_out"], params["b_out"])
    return jnp.transpose(out, (0, 3, 1, 2))


def ref_forward(params, conditioning_key, x, t, c_concat, c_crossattn):
    if conditioning_key == "hybrid":
        xc = jnp.concatenate([x] + list(c_concat), axis=1)
        cc = jnp.concatenate(list(c_crossattn), axis=1)
        return ref_diffusion_model(params, xc, t, context=cc)
    raise NotImplementedError


# -----------------------------------------------------------------------------

if __name__ == "__main__":
    B, C, H, W = 2, 4, 16, 16
    hidden, temb_dim, ctx_dim, seq = 32, 32, 32, 8
    concat_ch = 4
    conditioning_key = "hybrid"
    in_ch = C + concat_ch  # channel-concat conditioning, as in the wrapper

    key = jax.random.PRNGKey(0)
    k_par, k_x, k_c, k_cc = jax.random.split(key, 4)
    params = init_params(k_par, in_ch, C, hidden, temb_dim, ctx_dim,
                         adm_dim=hidden)

    x = jax.random.normal(k_x, (B, C, H, W), jnp.float32)
    c_concat = [jax.random.normal(k_c, (B, concat_ch, H, W), jnp.float32)]
    c_crossattn = [jax.random.normal(k_cc, (B, seq, ctx_dim), jnp.float32)]
    t = jnp.array([3, 17], dtype=jnp.int32)

    model = DiffusionWrapperPallas(params, conditioning_key)
    fwd = jax.jit(lambda x_, t_, cc, cca: model(x_, t_, c_concat=cc,
                                                c_crossattn=cca))
    out = jax.block_until_ready(fwd(x, t, c_concat, c_crossattn))
    assert out.shape == (B, C, H, W), out.shape

    ref = jax.block_until_ready(
        ref_forward(params, conditioning_key, x, t, c_concat, c_crossattn))
    # bf16 MXU operands (f32 accumulation) + approx-reciprocal softmax vs. the
    # pure-f32 reference; observed error is well below this bound.
    err = float(jnp.max(jnp.abs(out - ref)))
    assert err < 5e-2, f"max abs err {err}"

    print("KERNEL_OK")
</pallas_src>

<mosaic_0001>
module attributes {stable_mosaic.version = 11 : i64} {
  func.func @kernel(%arg0: i32, %arg1: memref<1x8x256xf32, #tpu.memory_space<vmem>>, %arg2: memref<9x256xf32, #tpu.memory_space<vmem>>, %arg3: memref<1x32x1xf32, #tpu.memory_space<vmem>>, %arg4: memref<32x72xbf16, #tpu.memory_space<vmem>>, %arg5: memref<9x4x32xbf16, #tpu.memory_space<vmem>>, %arg6: memref<4x1xf32, #tpu.memory_space<vmem>>, %arg7: memref<1x8x32xbf16, #tpu.memory_space<vmem>>, %arg8: memref<32x32xbf16, #tpu.memory_space<vmem>>, %arg9: memref<32x32xbf16, #tpu.memory_space<vmem>>, %arg10: memref<32x32xbf16, #tpu.memory_space<vmem>>, %arg11: memref<32x32xbf16, #tpu.memory_space<vmem>>, %arg12: memref<1x4x256xf32, #tpu.memory_space<vmem>>) attributes {dimension_semantics = [#tpu.dimension_semantics<parallel>], iteration_bounds = array<i64: 2>, scalar_prefetch = 0 : i64, scratch_operands = 0 : i64, tpu.core_type = #tpu.core_type<tc>, window_params = [{transform_indices = @transform_0, window_bounds = array<i64: 1, 8, 256>}, {pipeline_mode = #tpu.pipeline_mode<synchronous>, transform_indices = @transform_1, window_bounds = array<i64: 9, 256>}, {transform_indices = @transform_2, window_bounds = array<i64: 1, 32, 1>}, {pipeline_mode = #tpu.pipeline_mode<synchronous>, transform_indices = @transform_3, window_bounds = array<i64: 32, 72>}, {pipeline_mode = #tpu.pipeline_mode<synchronous>, transform_indices = @transform_4, window_bounds = array<i64: 9, 4, 32>}, {pipeline_mode = #tpu.pipeline_mode<synchronous>, transform_indices = @transform_5, window_bounds = array<i64: 4, 1>}, {transform_indices = @transform_6, window_bounds = array<i64: 1, 8, 32>}, {pipeline_mode = #tpu.pipeline_mode<synchronous>, transform_indices = @transform_7, window_bounds = array<i64: 32, 32>}, {pipeline_mode = #tpu.pipeline_mode<synchronous>, transform_indices = @transform_8, window_bounds = array<i64: 32, 32>}, {pipeline_mode = #tpu.pipeline_mode<synchronous>, transform_indices = @transform_9, window_bounds = array<i64: 32, 32>}, {pipeline_mode = #tpu.pipeline_mode<synchronous>, transform_indices = @transform_10, window_bounds = array<i64: 32, 32>}, {transform_indices = @transform_11, window_bounds = array<i64: 1, 4, 256>}]} {
    %c0 = arith.constant 0 : index
    %c0_0 = arith.constant 0 : index
    %0 = vector.load %arg2[%c0, %c0_0] : memref<9x256xf32, #tpu.memory_space<vmem>>, vector<9x256xf32>
    %c0_1 = arith.constant 0 : index
    %c0_2 = arith.constant 0 : index
    %c0_3 = arith.constant 0 : index
    %1 = vector.load %arg1[%c0_1, %c0_2, %c0_3] : memref<1x8x256xf32, #tpu.memory_space<vmem>>, vector<1x8x256xf32>
    %2 = vector.shape_cast %1 : vector<1x8x256xf32> to vector<8x256xf32>
    %c17_i32 = arith.constant 17 : i32
    %3 = tpu.dynamic_rotate %2 by %c17_i32 dim 1 : vector<8x256xf32>, i32 -> vector<8x256xf32>
    %4 = vector.extract_strided_slice %0 {offsets = [0, 0], sizes = [1, 256], strides = [1, 1]} : vector<9x256xf32> to vector<1x256xf32>
    %5 = vector.broadcast %4 : vector<1x256xf32> to vector<8x256xf32>
    %6 = arith.mulf %3, %5 : vector<8x256xf32>
    %c16_i32 = arith.constant 16 : i32
    %7 = tpu.dynamic_rotate %2 by %c16_i32 dim 1 : vector<8x256xf32>, i32 -> vector<8x256xf32>
    %8 = vector.extract_strided_slice %0 {offsets = [1, 0], sizes = [1, 256], strides = [1, 1]} : vector<9x256xf32> to vector<1x256xf32>
    %9 = vector.broadcast %8 : vector<1x256xf32> to vector<8x256xf32>
    %10 = arith.mulf %7, %9 : vector<8x256xf32>
    %c15_i32 = arith.constant 15 : i32
    %11 = tpu.dynamic_rotate %2 by %c15_i32 dim 1 : vector<8x256xf32>, i32 -> vector<8x256xf32>
    %12 = vector.extract_strided_slice %0 {offsets = [2, 0], sizes = [1, 256], strides = [1, 1]} : vector<9x256xf32> to vector<1x256xf32>
    %13 = vector.broadcast %12 : vector<1x256xf32> to vector<8x256xf32>
    %14 = arith.mulf %11, %13 : vector<8x256xf32>
    %c1_i32 = arith.constant 1 : i32
    %15 = tpu.dynamic_rotate %2 by %c1_i32 dim 1 : vector<8x256xf32>, i32 -> vector<8x256xf32>
    %16 = vector.extract_strided_slice %0 {offsets = [3, 0], sizes = [1, 256], strides = [1, 1]} : vector<9x256xf32> to vector<1x256xf32>
    %17 = vector.broadcast %16 : vector<1x256xf32> to vector<8x256xf32>
    %18 = arith.mulf %15, %17 : vector<8x256xf32>
    %c255_i32 = arith.constant 255 : i32
    %19 = tpu.dynamic_rotate %2 by %c255_i32 dim 1 : vector<8x256xf32>, i32 -> vector<8x256xf32>
    %20 = vector.extract_strided_slice %0 {offsets = [5, 0], sizes = [1, 256], strides = [1, 1]} : vector<9x256xf32> to vector<1x256xf32>
    %21 = vector.broadcast %20 : vector<1x256xf32> to vector<8x256xf32>
    %22 = arith.mulf %19, %21 : vector<8x256xf32>
    %c241_i32 = arith.constant 241 : i32
    %23 = tpu.dynamic_rotate %2 by %c241_i32 dim 1 : vector<8x256xf32>, i32 -> vector<8x256xf32>
    %24 = vector.extract_strided_slice %0 {offsets = [6, 0], sizes = [1, 256], strides = [1, 1]} : vector<9x256xf32> to vector<1x256xf32>
    %25 = vector.broadcast %24 : vector<1x256xf32> to vector<8x256xf32>
    %26 = arith.mulf %23, %25 : vector<8x256xf32>
    %c240_i32 = arith.constant 240 : i32
    %27 = tpu.dynamic_rotate %2 by %c240_i32 dim 1 : vector<8x256xf32>, i32 -> vector<8x256xf32>
    %28 = vector.extract_strided_slice %0 {offsets = [7, 0], sizes = [1, 256], strides = [1, 1]} : vector<9x256xf32> to vector<1x256xf32>
    %29 = vector.broadcast %28 : vector<1x256xf32> to vector<8x256xf32>
    %30 = arith.mulf %27, %29 : vector<8x256xf32>
    %c239_i32 = arith.constant 239 : i32
    %31 = tpu.dynamic_rotate %2 by %c239_i32 dim 1 : vector<8x256xf32>, i32 -> vector<8x256xf32>
    %32 = vector.extract_strided_slice %0 {offsets = [8, 0], sizes = [1, 256], strides = [1, 1]} : vector<9x256xf32> to vector<1x256xf32>
    %33 = vector.broadcast %32 : vector<1x256xf32> to vector<8x256xf32>
    %34 = arith.mulf %31, %33 : vector<8x256xf32>
    %35 = tpu.concatenate %6, %10, %14, %18, %2, %22, %26, %30, %34 in 0 : vector<8x256xf32>, vector<8x256xf32>, vector<8x256xf32>, vector<8x256xf32>, vector<8x256xf32>, vector<8x256xf32>, vector<8x256xf32>, vector<8x256xf32>, vector<8x256xf32> -> vector<72x256xf32>
    %36 = arith.truncf %35 : vector<72x256xf32> to vector<72x256xbf16>
    %c0_4 = arith.constant 0 : index
    %c0_5 = arith.constant 0 : index
    %37 = vector.load %arg4[%c0_4, %c0_5] : memref<32x72xbf16, #tpu.memory_space<vmem>>, vector<32x72xbf16>
    %cst = arith.constant dense<0.000000e+00> : vector<32x256xf32>
    %38 = tpu.matmul %37, %36, %cst {dimension_numbers = #tpu.dot_dimension_numbers<[1], [0], [0], [1], [0, 0, 1, 1], [], []>} : vector<32x72xbf16>, vector<72x256xbf16>, vector<32x256xf32> -> vector<32x256xf32>
    %c0_6 = arith.constant 0 : index
    %c0_7 = arith.constant 0 : index
    %c0_8 = arith.constant 0 : index
    %39 = vector.load %arg3[%c0_6, %c0_7, %c0_8] : memref<1x32x1xf32, #tpu.memory_space<vmem>>, vector<1x32x1xf32>
    %40 = vector.shape_cast %39 : vector<1x32x1xf32> to vector<32x1xf32>
    %41 = vector.broadcast %40 : vector<32x1xf32> to vector<32x256xf32>
    %42 = arith.addf %38, %41 : vector<32x256xf32>
    %43 = arith.negf %42 : vector<32x256xf32>
    %44 = math.exp %43 : vector<32x256xf32>
    %cst_9 = arith.constant 1.000000e+00 : f32
    %45 = vector.broadcast %cst_9 : f32 to vector<32x256xf32>
    %46 = arith.addf %45, %44 : vector<32x256xf32>
    %47 = arith.divf %45, %46 : vector<32x256xf32>
    %48 = arith.mulf %42, %47 : vector<32x256xf32>
    %49 = arith.truncf %48 : vector<32x256xf32> to vector<32x256xbf16>
    %c0_10 = arith.constant 0 : index
    %c0_11 = arith.constant 0 : index
    %c0_12 = arith.constant 0 : index
    %50 = vector.load %arg7[%c0_10, %c0_11, %c0_12] : memref<1x8x32xbf16, #tpu.memory_space<vmem>>, vector<1x8x32xbf16>
    %51 = vector.shape_cast %50 : vector<1x8x32xbf16> to vector<8x32xbf16>
    %c0_13 = arith.constant 0 : index
    %c0_14 = arith.constant 0 : index
    %52 = vector.load %arg8[%c0_13, %c0_14] : memref<32x32xbf16, #tpu.memory_space<vmem>>, vector<32x32xbf16>
    %cst_15 = arith.constant dense<0.000000e+00> : vector<32x256xf32>
    %53 = tpu.matmul %52, %49, %cst_15 {dimension_numbers = #tpu.dot_dimension_numbers<[1], [0], [0], [1], [0, 0, 1, 1], [], []>} : vector<32x32xbf16>, vector<32x256xbf16>, vector<32x256xf32> -> vector<32x256xf32>
    %c0_16 = arith.constant 0 : index
    %c0_17 = arith.constant 0 : index
    %54 = vector.load %arg9[%c0_16, %c0_17] : memref<32x32xbf16, #tpu.memory_space<vmem>>, vector<32x32xbf16>
    %cst_18 = arith.constant dense<0.000000e+00> : vector<8x32xf32>
    %55 = tpu.matmul %51, %54, %cst_18 {dimension_numbers = #tpu.dot_dimension_numbers<[1], [0], [0], [1], [0, 0, 1, 1], [], []>} : vector<8x32xbf16>, vector<32x32xbf16>, vector<8x32xf32> -> vector<8x32xf32>
    %c0_19 = arith.constant 0 : index
    %c0_20 = arith.constant 0 : index
    %56 = vector.load %arg10[%c0_19, %c0_20] : memref<32x32xbf16, #tpu.memory_space<vmem>>, vector<32x32xbf16>
    %cst_21 = arith.constant dense<0.000000e+00> : vector<32x8xf32>
    %57 = tpu.matmul %56, %51, %cst_21 {dimension_numbers = #tpu.dot_dimension_numbers<[1], [1], [0], [0], [0, 0, 1, 0], [], []>} : vector<32x32xbf16>, vector<8x32xbf16>, vector<32x8xf32> -> vector<32x8xf32>
    %58 = arith.truncf %55 : vector<8x32xf32> to vector<8x32xbf16>
    %59 = arith.truncf %53 : vector<32x256xf32> to vector<32x256xbf16>
    %cst_22 = arith.constant dense<0.000000e+00> : vector<8x256xf32>
    %60 = tpu.matmul %58, %59, %cst_22 {dimension_numbers = #tpu.dot_dimension_numbers<[1], [0], [0], [1], [0, 0, 1, 1], [], []>} : vector<8x32xbf16>, vector<32x256xbf16>, vector<8x256xf32> -> vector<8x256xf32>
    %cst_23 = arith.constant dense<0xFF800000> : vector<256xf32>
    %61 = vector.multi_reduction <maximumf>, %60, %cst_23 [0] : vector<8x256xf32> to vector<256xf32>
    %62 = vector.shape_cast %61 : vector<256xf32> to vector<1x256xf32>
    %63 = vector.broadcast %62 : vector<1x256xf32> to vector<8x256xf32>
    %64 = arith.subf %60, %63 : vector<8x256xf32>
    %65 = math.exp %64 : vector<8x256xf32>
    %cst_24 = arith.constant dense<0.000000e+00> : vector<256xf32>
    %66 = vector.multi_reduction <add>, %65, %cst_24 [0] : vector<8x256xf32> to vector<256xf32>
    %67 = vector.shape_cast %66 : vector<256xf32> to vector<1x256xf32>
    %68 = tpu.reciprocal %67 {approx = true} : vector<1x256xf32> -> vector<1x256xf32>
    %69 = vector.broadcast %68 : vector<1x256xf32> to vector<8x256xf32>
    %70 = arith.mulf %65, %69 : vector<8x256xf32>
    %71 = arith.truncf %70 : vector<8x256xf32> to vector<8x256xbf16>
    %72 = arith.truncf %57 : vector<32x8xf32> to vector<32x8xbf16>
    %cst_25 = arith.constant dense<0.000000e+00> : vector<32x256xf32>
    %73 = tpu.matmul %72, %71, %cst_25 {dimension_numbers = #tpu.dot_dimension_numbers<[1], [0], [0], [1], [0, 0, 1, 1], [], []>} : vector<32x8xbf16>, vector<8x256xbf16>, vector<32x256xf32> -> vector<32x256xf32>
    %c0_26 = arith.constant 0 : index
    %c0_27 = arith.constant 0 : index
    %74 = vector.load %arg11[%c0_26, %c0_27] : memref<32x32xbf16, #tpu.memory_space<vmem>>, vector<32x32xbf16>
    %75 = arith.truncf %73 : vector<32x256xf32> to vector<32x256xbf16>
    %cst_28 = arith.constant dense<0.000000e+00> : vector<32x256xf32>
    %76 = tpu.matmul %74, %75, %cst_28 {dimension_numbers = #tpu.dot_dimension_numbers<[1], [0], [0], [1], [0, 0, 1, 1], [], []>} : vector<32x32xbf16>, vector<32x256xbf16>, vector<32x256xf32> -> vector<32x256xf32>
    %77 = arith.addf %48, %76 : vector<32x256xf32>
    %c17_i32_29 = arith.constant 17 : i32
    %78 = tpu.dynamic_rotate %77 by %c17_i32_29 dim 1 : vector<32x256xf32>, i32 -> vector<32x256xf32>
    %79 = vector.extract_strided_slice %0 {offsets = [0, 0], sizes = [1, 256], strides = [1, 1]} : vector<9x256xf32> to vector<1x256xf32>
    %80 = vector.broadcast %79 : vector<1x256xf32> to vector<32x256xf32>
    %81 = arith.mulf %78, %80 : vector<32x256xf32>
    %82 = arith.truncf %81 : vector<32x256xf32> to vector<32x256xbf16>
    %c0_30 = arith.constant 0 : index
    %c0_31 = arith.constant 0 : index
    %c0_32 = arith.constant 0 : index
    %83 = vector.load %arg5[%c0_30, %c0_31, %c0_32] : memref<9x4x32xbf16, #tpu.memory_space<vmem>>, vector<1x4x32xbf16>
    %84 = vector.shape_cast %83 : vector<1x4x32xbf16> to vector<4x32xbf16>
    %cst_33 = arith.constant dense<0.000000e+00> : vector<4x256xf32>
    %85 = tpu.matmul %84, %82, %cst_33 {dimension_numbers = #tpu.dot_dimension_numbers<[1], [0], [0], [1], [0, 0, 1, 1], [], []>} : vector<4x32xbf16>, vector<32x256xbf16>, vector<4x256xf32> -> vector<4x256xf32>
    %c16_i32_34 = arith.constant 16 : i32
    %86 = tpu.dynamic_rotate %77 by %c16_i32_34 dim 1 : vector<32x256xf32>, i32 -> vector<32x256xf32>
    %87 = vector.extract_strided_slice %0 {offsets = [1, 0], sizes = [1, 256], strides = [1, 1]} : vector<9x256xf32> to vector<1x256xf32>
    %88 = vector.broadcast %87 : vector<1x256xf32> to vector<32x256xf32>
    %89 = arith.mulf %86, %88 : vector<32x256xf32>
    %90 = arith.truncf %89 : vector<32x256xf32> to vector<32x256xbf16>
    %c1 = arith.constant 1 : index
    %c0_35 = arith.constant 0 : index
    %c0_36 = arith.constant 0 : index
    %91 = vector.load %arg5[%c1, %c0_35, %c0_36] : memref<9x4x32xbf16, #tpu.memory_space<vmem>>, vector<1x4x32xbf16>
    %92 = vector.shape_cast %91 : vector<1x4x32xbf16> to vector<4x32xbf16>
    %cst_37 = arith.constant dense<0.000000e+00> : vector<4x256xf32>
    %93 = tpu.matmul %92, %90, %cst_37 {dimension_numbers = #tpu.dot_dimension_numbers<[1], [0], [0], [1], [0, 0, 1, 1], [], []>} : vector<4x32xbf16>, vector<32x256xbf16>, vector<4x256xf32> -> vector<4x256xf32>
    %94 = arith.addf %85, %93 : vector<4x256xf32>
    %c15_i32_38 = arith.constant 15 : i32
    %95 = tpu.dynamic_rotate %77 by %c15_i32_38 dim 1 : vector<32x256xf32>, i32 -> vector<32x256xf32>
    %96 = vector.extract_strided_slice %0 {offsets = [2, 0], sizes = [1, 256], strides = [1, 1]} : vector<9x256xf32> to vector<1x256xf32>
    %97 = vector.broadcast %96 : vector<1x256xf32> to vector<32x256xf32>
    %98 = arith.mulf %95, %97 : vector<32x256xf32>
    %99 = arith.truncf %98 : vector<32x256xf32> to vector<32x256xbf16>
    %c2 = arith.constant 2 : index
    %c0_39 = arith.constant 0 : index
    %c0_40 = arith.constant 0 : index
    %100 = vector.load %arg5[%c2, %c0_39, %c0_40] : memref<9x4x32xbf16, #tpu.memory_space<vmem>>, vector<1x4x32xbf16>
    %101 = vector.shape_cast %100 : vector<1x4x32xbf16> to vector<4x32xbf16>
    %cst_41 = arith.constant dense<0.000000e+00> : vector<4x256xf32>
    %102 = tpu.matmul %101, %99, %cst_41 {dimension_numbers = #tpu.dot_dimension_numbers<[1], [0], [0], [1], [0, 0, 1, 1], [], []>} : vector<4x32xbf16>, vector<32x256xbf16>, vector<4x256xf32> -> vector<4x256xf32>
    %103 = arith.addf %94, %102 : vector<4x256xf32>
    %c1_i32_42 = arith.constant 1 : i32
    %104 = tpu.dynamic_rotate %77 by %c1_i32_42 dim 1 : vector<32x256xf32>, i32 -> vector<32x256xf32>
    %105 = vector.extract_strided_slice %0 {offsets = [3, 0], sizes = [1, 256], strides = [1, 1]} : vector<9x256xf32> to vector<1x256xf32>
    %106 = vector.broadcast %105 : vector<1x256xf32> to vector<32x256xf32>
    %107 = arith.mulf %104, %106 : vector<32x256xf32>
    %108 = arith.truncf %107 : vector<32x256xf32> to vector<32x256xbf16>
    %c3 = arith.constant 3 : index
    %c0_43 = arith.constant 0 : index
    %c0_44 = arith.constant 0 : index
    %109 = vector.load %arg5[%c3, %c0_43, %c0_44] : memref<9x4x32xbf16, #tpu.memory_space<vmem>>, vector<1x4x32xbf16>
    %110 = vector.shape_cast %109 : vector<1x4x32xbf16> to vector<4x32xbf16>
    %cst_45 = arith.constant dense<0.000000e+00> : vector<4x256xf32>
    %111 = tpu.matmul %110, %108, %cst_45 {dimension_numbers = #tpu.dot_dimension_numbers<[1], [0], [0], [1], [0, 0, 1, 1], [], []>} : vector<4x32xbf16>, vector<32x256xbf16>, vector<4x256xf32> -> vector<4x256xf32>
    %112 = arith.addf %103, %111 : vector<4x256xf32>
    %113 = arith.truncf %77 : vector<32x256xf32> to vector<32x256xbf16>
    %c4 = arith.constant 4 : index
    %c0_46 = arith.constant 0 : index
    %c0_47 = arith.constant 0 : index
    %114 = vector.load %arg5[%c4, %c0_46, %c0_47] : memref<9x4x32xbf16, #tpu.memory_space<vmem>>, vector<1x4x32xbf16>
    %115 = vector.shape_cast %114 : vector<1x4x32xbf16> to vector<4x32xbf16>
    %cst_48 = arith.constant dense<0.000000e+00> : vector<4x256xf32>
    %116 = tpu.matmul %115, %113, %cst_48 {dimension_numbers = #tpu.dot_dimension_numbers<[1], [0], [0], [1], [0, 0, 1, 1], [], []>} : vector<4x32xbf16>, vector<32x256xbf16>, vector<4x256xf32> -> vector<4x256xf32>
    %117 = arith.addf %112, %116 : vector<4x256xf32>
    %c255_i32_49 = arith.constant 255 : i32
    %118 = tpu.dynamic_rotate %77 by %c255_i32_49 dim 1 : vector<32x256xf32>, i32 -> vector<32x256xf32>
    %119 = vector.extract_strided_slice %0 {offsets = [5, 0], sizes = [1, 256], strides = [1, 1]} : vector<9x256xf32> to vector<1x256xf32>
    %120 = vector.broadcast %119 : vector<1x256xf32> to vector<32x256xf32>
    %121 = arith.mulf %118, %120 : vector<32x256xf32>
    %122 = arith.truncf %121 : vector<32x256xf32> to vector<32x256xbf16>
    %c5 = arith.constant 5 : index
    %c0_50 = arith.constant 0 : index
    %c0_51 = arith.constant 0 : index
    %123 = vector.load %arg5[%c5, %c0_50, %c0_51] : memref<9x4x32xbf16, #tpu.memory_space<vmem>>, vector<1x4x32xbf16>
    %124 = vector.shape_cast %123 : vector<1x4x32xbf16> to vector<4x32xbf16>
    %cst_52 = arith.constant dense<0.000000e+00> : vector<4x256xf32>
    %125 = tpu.matmul %124, %122, %cst_52 {dimension_numbers = #tpu.dot_dimension_numbers<[1], [0], [0], [1], [0, 0, 1, 1], [], []>} : vector<4x32xbf16>, vector<32x256xbf16>, vector<4x256xf32> -> vector<4x256xf32>
    %126 = arith.addf %117, %125 : vector<4x256xf32>
    %c241_i32_53 = arith.constant 241 : i32
    %127 = tpu.dynamic_rotate %77 by %c241_i32_53 dim 1 : vector<32x256xf32>, i32 -> vector<32x256xf32>
    %128 = vector.extract_strided_slice %0 {offsets = [6, 0], sizes = [1, 256], strides = [1, 1]} : vector<9x256xf32> to vector<1x256xf32>
    %129 = vector.broadcast %128 : vector<1x256xf32> to vector<32x256xf32>
    %130 = arith.mulf %127, %129 : vector<32x256xf32>
    %131 = arith.truncf %130 : vector<32x256xf32> to vector<32x256xbf16>
    %c6 = arith.constant 6 : index
    %c0_54 = arith.constant 0 : index
    %c0_55 = arith.constant 0 : index
    %132 = vector.load %arg5[%c6, %c0_54, %c0_55] : memref<9x4x32xbf16, #tpu.memory_space<vmem>>, vector<1x4x32xbf16>
    %133 = vector.shape_cast %132 : vector<1x4x32xbf16> to vector<4x32xbf16>
    %cst_56 = arith.constant dense<0.000000e+00> : vector<4x256xf32>
    %134 = tpu.matmul %133, %131, %cst_56 {dimension_numbers = #tpu.dot_dimension_numbers<[1], [0], [0], [1], [0, 0, 1, 1], [], []>} : vector<4x32xbf16>, vector<32x256xbf16>, vector<4x256xf32> -> vector<4x256xf32>
    %135 = arith.addf %126, %134 : vector<4x256xf32>
    %c240_i32_57 = arith.constant 240 : i32
    %136 = tpu.dynamic_rotate %77 by %c240_i32_57 dim 1 : vector<32x256xf32>, i32 -> vector<32x256xf32>
    %137 = vector.extract_strided_slice %0 {offsets = [7, 0], sizes = [1, 256], strides = [1, 1]} : vector<9x256xf32> to vector<1x256xf32>
    %138 = vector.broadcast %137 : vector<1x256xf32> to vector<32x256xf32>
    %139 = arith.mulf %136, %138 : vector<32x256xf32>
    %140 = arith.truncf %139 : vector<32x256xf32> to vector<32x256xbf16>
    %c7 = arith.constant 7 : index
    %c0_58 = arith.constant 0 : index
    %c0_59 = arith.constant 0 : index
    %141 = vector.load %arg5[%c7, %c0_58, %c0_59] : memref<9x4x32xbf16, #tpu.memory_space<vmem>>, vector<1x4x32xbf16>
    %142 = vector.shape_cast %141 : vector<1x4x32xbf16> to vector<4x32xbf16>
    %cst_60 = arith.constant dense<0.000000e+00> : vector<4x256xf32>
    %143 = tpu.matmul %142, %140, %cst_60 {dimension_numbers = #tpu.dot_dimension_numbers<[1], [0], [0], [1], [0, 0, 1, 1], [], []>} : vector<4x32xbf16>, vector<32x256xbf16>, vector<4x256xf32> -> vector<4x256xf32>
    %144 = arith.addf %135, %143 : vector<4x256xf32>
    %c239_i32_61 = arith.constant 239 : i32
    %145 = tpu.dynamic_rotate %77 by %c239_i32_61 dim 1 : vector<32x256xf32>, i32 -> vector<32x256xf32>
    %146 = vector.extract_strided_slice %0 {offsets = [8, 0], sizes = [1, 256], strides = [1, 1]} : vector<9x256xf32> to vector<1x256xf32>
    %147 = vector.broadcast %146 : vector<1x256xf32> to vector<32x256xf32>
    %148 = arith.mulf %145, %147 : vector<32x256xf32>
    %149 = arith.truncf %148 : vector<32x256xf32> to vector<32x256xbf16>
    %c8 = arith.constant 8 : index
    %c0_62 = arith.constant 0 : index
    %c0_63 = arith.constant 0 : index
    %150 = vector.load %arg5[%c8, %c0_62, %c0_63] : memref<9x4x32xbf16, #tpu.memory_space<vmem>>, vector<1x4x32xbf16>
    %151 = vector.shape_cast %150 : vector<1x4x32xbf16> to vector<4x32xbf16>
    %cst_64 = arith.constant dense<0.000000e+00> : vector<4x256xf32>
    %152 = tpu.matmul %151, %149, %cst_64 {dimension_numbers = #tpu.dot_dimension_numbers<[1], [0], [0], [1], [0, 0, 1, 1], [], []>} : vector<4x32xbf16>, vector<32x256xbf16>, vector<4x256xf32> -> vector<4x256xf32>
    %153 = arith.addf %144, %152 : vector<4x256xf32>
    %c0_65 = arith.constant 0 : index
    %c0_66 = arith.constant 0 : index
    %154 = vector.load %arg6[%c0_65, %c0_66] : memref<4x1xf32, #tpu.memory_space<vmem>>, vector<4x1xf32>
    %155 = vector.broadcast %154 : vector<4x1xf32> to vector<4x256xf32>
    %156 = arith.addf %153, %155 : vector<4x256xf32>
    %c0_67 = arith.constant 0 : index
    %c0_68 = arith.constant 0 : index
    %c0_69 = arith.constant 0 : index
    %157 = vector.load %arg12[%c0_67, %c0_68, %c0_69] : memref<1x4x256xf32, #tpu.memory_space<vmem>>, vector<1x4x256xf32>
    %158 = vector.shape_cast %157 : vector<1x4x256xf32> to vector<4x256xf32>
    %159 = vector.shape_cast %156 : vector<4x256xf32> to vector<1x4x256xf32>
    tpu.vector_store %arg12[%c0_67, %c0_68, %c0_69], %159 {strides = array<i32>} : memref<1x4x256xf32, #tpu.memory_space<vmem>>, vector<1x4x256xf32>,
    return
  }
  func.func @transform_0(%arg0: i32) -> (i32, i32, i32) {
    %c0_i32 = arith.constant 0 : i32
    %c0_i32_0 = arith.constant 0 : i32
    %c0_i32_1 = arith.constant 0 : i32
    return %arg0, %c0_i32, %c0_i32_0 : i32, i32, i32
  }
  func.func @transform_1(%arg0: i32) -> (i32, i32) {
    %c0_i32 = arith.constant 0 : i32
    %c0_i32_0 = arith.constant 0 : i32
    %c0_i32_1 = arith.constant 0 : i32
    return %c0_i32, %c0_i32_0 : i32, i32
  }
  func.func @transform_2(%arg0: i32) -> (i32, i32, i32) {
    %c0_i32 = arith.constant 0 : i32
    %c0_i32_0 = arith.constant 0 : i32
    %c0_i32_1 = arith.constant 0 : i32
    return %arg0, %c0_i32, %c0_i32_0 : i32, i32, i32
  }
  func.func @transform_3(%arg0: i32) -> (i32, i32) {
    %c0_i32 = arith.constant 0 : i32
    %c0_i32_0 = arith.constant 0 : i32
    %c0_i32_1 = arith.constant 0 : i32
    return %c0_i32, %c0_i32_0 : i32, i32
  }
  func.func @transform_4(%arg0: i32) -> (i32, i32, i32) {
    %c0_i32 = arith.constant 0 : i32
    %c0_i32_0 = arith.constant 0 : i32
    %c0_i32_1 = arith.constant 0 : i32
    %c0_i32_2 = arith.constant 0 : i32
    return %c0_i32, %c0_i32_0, %c0_i32_1 : i32, i32, i32
  }
  func.func @transform_5(%arg0: i32) -> (i32, i32) {
    %c0_i32 = arith.constant 0 : i32
    %c0_i32_0 = arith.constant 0 : i32
    %c0_i32_1 = arith.constant 0 : i32
    return %c0_i32, %c0_i32_0 : i32, i32
  }
  func.func @transform_6(%arg0: i32) -> (i32, i32, i32) {
    %c0_i32 = arith.constant 0 : i32
    %c0_i32_0 = arith.constant 0 : i32
    %c0_i32_1 = arith.constant 0 : i32
    return %arg0, %c0_i32, %c0_i32_0 : i32, i32, i32
  }
  func.func @transform_7(%arg0: i32) -> (i32, i32) {
    %c0_i32 = arith.constant 0 : i32
    %c0_i32_0 = arith.constant 0 : i32
    %c0_i32_1 = arith.constant 0 : i32
    return %c0_i32, %c0_i32_0 : i32, i32
  }
  func.func @transform_8(%arg0: i32) -> (i32, i32) {
    %c0_i32 = arith.constant 0 : i32
    %c0_i32_0 = arith.constant 0 : i32
    %c0_i32_1 = arith.constant 0 : i32
    return %c0_i32, %c0_i32_0 : i32, i32
  }
  func.func @transform_9(%arg0: i32) -> (i32, i32) {
    %c0_i32 = arith.constant 0 : i32
    %c0_i32_0 = arith.constant 0 : i32
    %c0_i32_1 = arith.constant 0 : i32
    return %c0_i32, %c0_i32_0 : i32, i32
  }
  func.func @transform_10(%arg0: i32) -> (i32, i32) {
    %c0_i32 = arith.constant 0 : i32
    %c0_i32_0 = arith.constant 0 : i32
    %c0_i32_1 = arith.constant 0 : i32
    return %c0_i32, %c0_i32_0 : i32, i32
  }
  func.func @transform_11(%arg0: i32) -> (i32, i32, i32) {
    %c0_i32 = arith.constant 0 : i32
    %c0_i32_0 = arith.constant 0 : i32
    %c0_i32_1 = arith.constant 0 : i32
    return %arg0, %c0_i32, %c0_i32_0 : i32, i32, i32
  }
}

</mosaic_0001>

<bundles_post_ra>
// kernel: _lambda_.1
= control target key start
LH: loop header
LB: loop body
LE: loop exit
PB: predicated region body
PF: predicated region fallthrough
CT: control target
= control target key end

     0   :  { %s2237_s17 = smov 0   ;;  %s3094_s0 = inlined_call_operand.vmem [shape: f32[2,8,256], index: 0, kind: input, shape index: {}]   ;;  %s3095_s1 = inlined_call_operand.vmem [shape: f32[9,256], index: 1, kind: input, shape index: {}]   ;;  %s3096_s2 = inlined_call_operand.vmem [shape: f32[2,32,1], index: 2, kind: input, shape index: {}]   ;;  %s3097_s3 = inlined_call_operand.vmem [shape: bf16[32,72], index: 3, kind: input, shape index: {}]   ;;  %s3098_s4 = inlined_call_operand.vmem [shape: bf16[9,4,32], index: 4, kind: input, shape index: {}]   ;;  %s3099_s5 = inlined_call_operand.vmem [shape: f32[4,1], index: 5, kind: input, shape index: {}]   ;;  %s3100_s6 = inlined_call_operand.vmem [shape: bf16[2,8,32], index: 6, kind: input, shape index: {}]   ;;  %s3101_s7 = inlined_call_operand.vmem [shape: bf16[32,32], index: 7, kind: input, shape index: {}]   ;;  %s3102_s8 = inlined_call_operand.vmem [shape: bf16[32,32], index: 8, kind: input, shape index: {}]   ;;  %s3103_s9 = inlined_call_operand.vmem [shape: bf16[32,32], index: 9, kind: input, shape index: {}]   ;;  %s3104_s10 = inlined_call_operand.vmem [shape: bf16[32,32], index: 10, kind: input, shape index: {}]   ;;  %s3105_s11 = inlined_call_operand.vmem [shape: f32[2,4,256], index: 11, kind: output, shape index: {}]  }
   0x1 LB: > { %s1996_s18 = sadd.s32 4294967295, %s2164_s17   ;;  %p2000_p0 = scmp.ge.s32.totalorder %s2164_s17, 1  ;;  %s2164_s17 = sphi %s2237_s17, %s21_s17  }
   0x2   : > { %p356_p1 = scmp.lt.s32.totalorder %s2164_s17, 3 }
   0x4   : > { %p357_p2 = pnand %p2000_p0, %p356_p1 }
   0x6   : > { %360 = sbr.rel (%p357_p2) target bundleno = 1765 (0x6e5), region = 64 }
   0xb   : > { %p405_p3 = scmp.lt.s32.totalorder %s1996_s18, 1  ;;  %s2166_s23 = smov 113   ;;  %v3106_v2 = vmov 0   ;;  %v435_v7 = vlaneseq  ;;  %v2303_v13 = vld [vmem:[%s3095_s1] sm:$0xff]  ;;  %v2309_v15 = vld [vmem:[%s3095_s1 + $0x8] sm:$0xff]  ;;  %vm624_vm3 = vcmask 1043456  }
   0xc   : > { %s2167_s24 = smov 111   ;;  %s2168_s25 = smov 112   ;;  %663 = vmatprep.mubr.bf16.mxu0 %v3106_v2  ;;  %2105 = vset.pattern.permute.xlu1 %v3106_v2  ;;  %v2008_v16 = vld [vmem:[%s3095_s1 + $0x10] ss:$0 sm:$0xff]  ;;  %v2009_v17 = vld [vmem:[%s3095_s1 + $0x18] ss:$0 sm:$0xff] }
   0xd   : > { %s3180_s18 = smov (!%p405_p3, %s1996_s18), 1  ;;  %s2169_s26 = smov 127   ;;  %2104 = vset.pattern.permute.xlu0 %v3106_v2  ;;  %798 = vmatprep.mubr.bf16.mxu1 %v3106_v2  ;;  %v2295_v8 = vshrl.u32 %v435_v7, 7  ;;  %v2297_v9 = vand.u32 127, %v435_v7  ;;  %vm617_vm9 = vcmask 588800   ;;  %vm759_vm10 = vcmask 261120  }
   0xe   : > { %s2061_s19 = sshll.u32 %s3180_s18, 4  ;;  %s2170_s27 = smov 15   ;;  %vm2176_vm11 = vmmov 0   ;;  %vm1034_vm12 = vcmask 64512  }
   0xf   : > { %s409_s22 = scalar_lea.vmem %s3094_s0, %s2061_s19  ;;  %s2171_s28 = smov 1   ;;  %v527_v12 = vsub.s32 6, %v2295_v8  ;;  %v544_v14 = vsub.s32 7, %v2295_v8  ;;  %vm556_vm0 = vcmp.lt.s32.totalorder %v2297_v9, 111  ;;  %vm522_vm1 = vcmp.lt.s32.totalorder %v2297_v9, 113 }
  0x10   : > { %v2251_v0 = vld [vmem:[%s409_s22] sm:$0xff]  ;;  %v2253_v1 = vld [vmem:[%s409_s22 + $0x8] sm:$0xff]  ;;  %s2173_s29 = smov 17   ;;  %s2174_s30 = smov 16   ;;  %vm539_vm2 = vcmp.lt.s32.totalorder %v2297_v9, 112  ;;  %v510_v21 = vsub.s32 5, %v2295_v8 }
  0x11   : > { %518 = vrot.lane.b32.xlu1 %v2251_v0, %s2166_s23  ;;  %552 = vrot.lane.b32.xlu0 %v2251_v0, %s2167_s24  ;;  %s2062_s12 = sshll.u32 %s3180_s18, 5  ;;  %v2320_v18 = vrot.slane %v2303_v13, %v527_v12  ;;  %v2325_v22 = vrot.slane %v2309_v15, %v527_v12  ;;  %v2332_v25 = vrot.slane %v2303_v13, %v544_v14  ;;  %vm505_vm4 = vcmp.lt.s32.totalorder %v2297_v9, 127  ;;  %s2005_s14 = sshll.u32 %s3180_s18, 2 }
  0x12   : > { %s414_s15 = scalar_lea.vmem %s3096_s2, %s2062_s12  ;;  %v2337_v28 = vrot.slane %v2309_v15, %v544_v14  ;;  %v2343_v35 = vrot.slane %v2303_v13, %v510_v21  ;;  %v2351_v39 = vrot.slane %v2309_v15, %v510_v21  ;;  %v476_v50 = vsub.s32 2, %v2295_v8  ;;  %s418_s21 = scalar_lea.vmem %s3100_s6, %s2005_s14 }
  0x13   : > { %v586_v3 = vld [vmem:[%s414_s15 + $0x18] sm:$0xff]  ;;  %v585_v4 = vld [vmem:[%s414_s15 + $0x10] sm:$0xff]  ;;  %v583_v5 = vld [vmem:[%s414_s15] sm:$0xff]  ;;  %3128 = vst [vmem:[#allocation2_spill] sm:$0xff] %v2332_v25  ;;  %v493_v53 = vsub.s32 3, %v2295_v8  ;;  %vm471_vm5 = vcmp.lt.s32.totalorder %v2297_v9, 15 }
  0x14   : > { %v584_v6 = vld [vmem:[%s414_s15 + $0x8] sm:$0xff]  ;;  %3129 = vst [vmem:[#allocation3_spill] sm:$0xff] %v2337_v28  ;;  %v2370_v58 = vrot.slane %v2303_v13, %v476_v50  ;;  %v2373_v59 = vrot.slane %v2309_v15, %v476_v50  ;;  %vm488_vm6 = vcmp.lt.s32.totalorder %v2297_v9, 1  ;;  %vm437_vm7 = vcmp.lt.s32.totalorder %v2297_v9, 17 }
  0x15   : > { %520 = vrot.lane.b32.xlu1 %v2253_v1, %s2166_s23  ;;  %554 = vrot.lane.b32.xlu0 %v2253_v1, %s2167_s24  ;;  %v2377_v60 = vrot.slane %v2303_v13, %v493_v53  ;;  %v2380_v61 = vrot.slane %v2309_v15, %v493_v53  ;;  %vm454_vm8 = vcmp.lt.s32.totalorder %v2297_v9, 16  ;;  %v2055_v9 = vld [vmem:[%s3098_s4 + $0xe] sm:$0x3] }
  0x19   : > { %537 = vrot.lane.b32.xlu1 %v2253_v1, %s2168_s25  ;;  %535 = vrot.lane.b32.xlu0 %v2251_v0, %s2168_s25 }
  0x1d   : > { %503 = vrot.lane.b32.xlu1 %v2253_v1, %s2169_s26  ;;  %501 = vrot.lane.b32.xlu0 %v2251_v0, %s2169_s26 }
  0x21   : > { %469 = vrot.lane.b32.xlu1 %v2253_v1, %s2170_s27  ;;  %467 = vrot.lane.b32.xlu0 %v2251_v0, %s2170_s27 }
  0x25   : > { %486 = vrot.lane.b32.xlu1 %v2253_v1, %s2171_s28  ;;  %484 = vrot.lane.b32.xlu0 %v2251_v0, %s2171_s28 }
  0x29   : > { %433 = vrot.lane.b32.xlu1 %v2253_v1, %s2173_s29  ;;  %431 = vrot.lane.b32.xlu0 %v2251_v0, %s2173_s29 }
  0x2d   : > { %452 = vrot.lane.b32.xlu1 %v2253_v1, %s2174_s30  ;;  %450 = vrot.lane.b32.xlu0 %v2251_v0, %s2174_s30 }
  0x31   : > { %604 = vperm.xlu1 %2105, %v586_v3   ;;  %599 = vperm.xlu0 %2104, %v585_v4  }
  0x35   : > { %589 = vperm.xlu1 %2105, %v583_v5   ;;  %594 = vperm.xlu0 %2104, %v584_v6   ;;  %v442_v5 = vsub.s32 0, %v2295_v8  ;;  %v459_v6 = vsub.s32 1, %v2295_v8 }
  0x37   : > { %v2401_v21 = vrot.slane %v2309_v15, %v442_v5  ;;  %v2405_v8 = vrot.slane %v2303_v13, %v459_v6 }
  0x83   : > { %v519_v10 = vpop.permute.xlu1 %518  ;;  %v553_v11 = vpop.permute.xlu0 %552 }
  0x87   : > { %v521_v19 = vpop.permute.xlu1 %520  ;;  %v555_v20 = vpop.permute.xlu0 %554 }
  0x88   : > { %v557_v23 = vsel %vm556_vm0, %v553_v11, %v555_v20  ;;  %v558_v24 = vsel %vm556_vm0, %v555_v20, %v553_v11  ;;  %v523_v26 = vsel %vm522_vm1, %v519_v10, %v521_v19  ;;  %v524_v30 = vsel %vm522_vm1, %v521_v19, %v519_v10 }
  0x89   : > { %v567_v27 = vmul.f32 %v2008_v16, %v557_v23  ;;  %v568_v29 = vmul.f32 %v2009_v17, %v558_v24  ;;  %v533_v36 = vmul.f32 %v2320_v18, %v523_v26  ;;  %v534_v40 = vmul.f32 %v2325_v22, %v524_v30 }
  0x8a   : > { %v2398_v20 = vrot.slane %v2303_v13, %v442_v5  ;;  %v2408_v23 = vrot.slane %v2309_v15, %v459_v6 }
  0x8b   : > { %v538_v31 = vpop.permute.xlu1 %537  ;;  %v536_v32 = vpop.permute.xlu0 %535  ;;  %v578_v33 = vpack.c.bf16 %v568_v29, %v568_v29  ;;  %v577_v34 = vpack.c.bf16 %v567_v27, %v567_v27 }
  0x8c   : > { %v540_v37 = vsel %vm539_vm2, %v536_v32, %v538_v31  ;;  %v541_v38 = vsel %vm539_vm2, %v538_v31, %v536_v32 }
  0x8d   : > { %v550_v41 = vmul.f32 %v2332_v25, %v540_v37  ;;  %v551_v42 = vmul.f32 %v2337_v28, %v541_v38  ;;  %2012 = vmatprep.subr.msk.bf16.mxu0 %vm624_vm3, %v578_v33  ;;  %v626_v43 = vsel %vm624_vm3, %v577_v34, 0  ;;  %v2106_v37 = vld [vmem:[%s3097_s3] sm:$0xff]   ;;  %v2107_v38 = vld [vmem:[%s3097_s3 + $0x8] sm:$0xff]  }
  0x8e   : > { %638 = vmatpush1.bf16.msra.mxu0 %v626_v43 }
  0x8f   : > { %v504_v44 = vpop.permute.xlu1 %503  ;;  %v502_v45 = vpop.permute.xlu0 %501  ;;  %v576_v46 = vpack.c.bf16 %v551_v42, %v534_v40  ;;  %v575_v47 = vpack.c.bf16 %v550_v41, %v533_v36 }
  0x90   : > { %v506_v48 = vsel %vm505_vm4, %v502_v45, %v504_v44  ;;  %v507_v49 = vsel %vm505_vm4, %v504_v44, %v502_v45 }
  0x91   : > { %v516_v51 = vmul.f32 %v2343_v35, %v506_v48  ;;  %v517_v52 = vmul.f32 %v2351_v39, %v507_v49  ;;  %639 = vmatprep.subr.bf16.mxu0 %v576_v46 }
  0x92   : > { %640 = vmatpush1.bf16.msra.mxu0 %v575_v47 }
  0x93   : > { %v470_v54 = vpop.permute.xlu1 %469  ;;  %v468_v55 = vpop.permute.xlu0 %467  ;;  %v574_v56 = vpack.c.bf16 %v517_v52, %v2253_v1  ;;  %v573_v57 = vpack.c.bf16 %v516_v51, %v2251_v0 }
  0x94   : > { %v472_v62 = vsel %vm471_vm5, %v468_v55, %v470_v54  ;;  %v473_v63 = vsel %vm471_vm5, %v470_v54, %v468_v55 }
  0x95   : > { %641 = vmatprep.subr.bf16.mxu0 %v574_v56  ;;  %v482_v7 = vmul.f32 %v2370_v58, %v473_v63  ;;  %v483_v10 = vmul.f32 %v2373_v59, %v472_v62 }
  0x96   : > { %642 = vmatpush1.bf16.msra.mxu0 %v573_v57 }
  0x97   : > { %v487_v0 = vpop.permute.xlu1 %486  ;;  %v485_v1 = vpop.permute.xlu0 %484 }
  0x98   : > { %v489_v3 = vsel %vm488_vm6, %v485_v1, %v487_v0  ;;  %v490_v4 = vsel %vm488_vm6, %v487_v0, %v485_v1 }
  0x99   : > { %v499_v11 = vmul.f32 %v2377_v60, %v490_v4  ;;  %v500_v12 = vmul.f32 %v2380_v61, %v489_v3 }
  0x9b   : > { %v434_v14 = vpop.permute.xlu1 %433  ;;  %v432_v16 = vpop.permute.xlu0 %431  ;;  %v572_v17 = vpack.c.bf16 %v500_v12, %v483_v10  ;;  %v571_v19 = vpack.c.bf16 %v499_v11, %v482_v7 }
  0x9c   : > { %v438_v24 = vsel %vm437_vm7, %v432_v16, %v434_v14  ;;  %v439_v26 = vsel %vm437_vm7, %v434_v14, %v432_v16 }
  0x9d   : > { %643 = vmatprep.subr.bf16.mxu0 %v572_v17  ;;  %v448_v13 = vmul.f32 %v2398_v20, %v439_v26  ;;  %v449_v15 = vmul.f32 %v2401_v21, %v438_v24 }
  0x9e   : > { %644 = vmatpush1.bf16.msra.mxu0 %v571_v19 }
  0x9f   : > { %v453_v27 = vpop.permute.xlu1 %452  ;;  %v451_v29 = vpop.permute.xlu0 %450 }
  0xa0   : > { %v455_v30 = vsel %vm454_vm8, %v451_v29, %v453_v27  ;;  %v456_v31 = vsel %vm454_vm8, %v453_v27, %v451_v29 }
  0xa1   : > { %v465_v32 = vmul.f32 %v2405_v8, %v456_v31  ;;  %v466_v33 = vmul.f32 %v2408_v23, %v455_v30 }
  0xa3   : > { %v570_v34 = vpack.c.bf16 %v466_v33, %v449_v15  ;;  %v569_v36 = vpack.c.bf16 %v465_v32, %v448_v13 }
  0xa5   : > { %645 = vmatprep.subr.bf16.mxu0 %v570_v34 }
  0xa6   : > { %646 = vmatpush1.bf16.msra.mxu0 %v569_v36 }
  0xa9   : > { %2013 = vmatmul.mubr.msk.bf16.vlgmr.msra.gmra.mxu0 %vm617_vm9, %v2106_v37 }
  0xaa   : > { %673 = vmatprep.mubr.bf16.mxu0 %v3106_v2 }
  0xac   : > { %v605_v40 = vpop.permute.xlu1 %604  ;;  %v600_v41 = vpop.permute.xlu0 %599 }
  0xb0   : > { %v590_v43 = vpop.permute.xlu1 %589  ;;  %v595_v47 = vpop.permute.xlu0 %594 }
  0xb1   : > { %2014 = vmatmul.mubr.msk.bf16.gmra.mxu0 %vm617_vm9, %v2107_v38 }
  0xb2   : > { %987 = vmatprep.mubr.bf16.mxu0 %v3106_v2 }
 0x169   : > { %v665_v42 = vpop.f32.mrf.mxu0 }
 0x16a   : > { %v2435_v55 = vadd.f32 %v665_v42, %v590_v43 }
 0x16b   : > { %v667_v44 = vpop.f32.mrf.mxu0 }
 0x16c   : > { %v2430_v45 = vadd.f32 %v667_v44, %v590_v43  ;;  %v2015_v4 = vmul.f32 -1.442695, %v2435_v55 }
 0x16d   : > { %v669_v46 = vpop.f32.mrf.mxu0 }
 0x16e   : > { %v2016_v48 = vmul.f32 -1.442695, %v2430_v45  ;;  %v2433_v51 = vadd.f32 %v669_v46, %v595_v47 }
 0x16f   : > { %v671_v49 = vpop.f32.mrf.mxu0 }
 0x170   : > { %v672_v50 = vadd.f32 %v671_v49, %v595_v47  ;;  %2116 = vpow2.f32 %v2016_v48  ;;  %v2017_v63 = vmul.f32 -1.442695, %v2433_v51 }
 0x171   : > { %v675_v52 = vpop.f32.mrf.mxu0 }
 0x172   : > { %v2018_v53 = vmul.f32 -1.442695, %v672_v50  ;;  %v676_v54 = vadd.f32 %v675_v52, %v600_v41 }
 0x173   : > { %v677_v56 = vpop.f32.mrf.mxu0 }
 0x174   : > { %2118 = vpow2.f32 %v2018_v53  ;;  %v2019_v57 = vmul.f32 -1.442695, %v676_v54  ;;  %v678_v62 = vadd.f32 %v677_v56, %v600_v41 }
 0x175   : > { %v679_v0 = vpop.f32.mrf.mxu0 }
 0x176   : > { %v2020_v1 = vmul.f32 -1.442695, %v678_v62  ;;  %v680_v3 = vadd.f32 %v679_v0, %v605_v40  ;;  %2120 = vpow2.f32 %v2019_v57  ;;  %v2109_v0 = vld [vmem:[%s3101_s7 + $0x8] sm:$0xff]  }
 0x177   : > { %v681_v5 = vpop.f32.mrf.mxu0 }
 0x178   : > { %2122 = vpow2.f32 %v2020_v1  ;;  %v2021_v6 = vmul.f32 -1.442695, %v680_v3  ;;  %v682_v7 = vadd.f32 %v681_v5, %v605_v40  ;;  %v744_v1 = vld [vmem:[%s418_s21] sm:$0xf]  ;;  %v2113_v5 = vld [vmem:[%s3103_s9 + $0x8] sm:$0xff]  }
 0x179   : > { %2124 = vpow2.f32 %v2017_v63  ;;  %v2175_v63 = vmov 0.0  }
 0x17a   : > { %2126 = vpow2.f32 %v2021_v6  ;;  %v2022_v10 = vmul.f32 -1.442695, %v682_v7 }
 0x17b   : > { %2128 = vpow2.f32 %v2015_v4  ;;  %v2112_v4 = vld [vmem:[%s3103_s9] sm:$0xff]  }
 0x17c   : > { %2130 = vpow2.f32 %v2022_v10 }
 0x17d   : > { %v2117_v11 = vpop.eup %2116 }
 0x17e   : > { %v709_v14 = vadd.f32 1.0, %v2117_v11 }
 0x180   : > { %2132 = vrcp.f32 %v709_v14 }
 0x181   : > { %v2119_v12 = vpop.eup %2118 }
 0x182   : > { %v711_v17 = vadd.f32 1.0, %v2119_v12 }
 0x183   : > { %v2121_v16 = vpop.eup %2120 }
 0x184   : > { %v712_v29 = vadd.f32 1.0, %v2121_v16  ;;  %2134 = vrcp.f32 %v711_v17 }
 0x185   : > { %v2123_v19 = vpop.eup %2122 }
 0x186   : > { %v2125_v24 = vpop.eup %2124  ;;  %v713_v26 = vadd.f32 1.0, %v2123_v19 }
 0x187   : > { %v2127_v27 = vpop.eup %2126  ;;  %v710_v15 = vadd.f32 1.0, %v2125_v24 }
 0x188   : > { %v2129_v30 = vpop.eup %2128  ;;  %v714_v31 = vadd.f32 1.0, %v2127_v27  ;;  %2136 = vrcp.f32 %v713_v26 }
 0x189   : > { %v2131_v13 = vpop.eup %2130  ;;  %v708_v33 = vadd.f32 1.0, %v2129_v30 }
 0x18a   : > { %2138 = vrcp.f32 %v714_v31  ;;  %v715_v32 = vadd.f32 1.0, %v2131_v13 }
 0x18b   : > { %2140 = vrcp.f32 %v712_v29 }
 0x18c   : > { %2142 = vrcp.f32 %v715_v32 }
 0x18d   : > { %2144 = vrcp.f32 %v710_v15  ;;  %v2133_v34 = vpop.eup %2132 }
 0x18e   : > { %2146 = vrcp.f32 %v708_v33  ;;  %v2450_v52 = vmul.f32 %v2133_v34, %v2430_v45 }
 0x191   : > { %v2135_v36 = vpop.eup %2134 }
 0x192   : > { %v2441_v44 = vmul.f32 %v2135_v36, %v672_v50 }
 0x194   : > { %v741_v57 = vpack.c.bf16 %v2441_v44, %v2450_v52 }
 0x195   : > { %v2137_v37 = vpop.eup %2136 }
 0x196   : > { %v2443_v46 = vmul.f32 %v2137_v37, %v678_v62  ;;  %v2110_v62 = vld [vmem:[%s3102_s8 + $0x8] sm:$0xff]  }
 0x197   : > { %v2139_v38 = vpop.eup %2138 }
 0x198   : > { %v2141_v40 = vpop.eup %2140  ;;  %v2439_v42 = vmul.f32 %v2139_v38, %v680_v3  ;;  %v836_v3 = vsel %vm759_vm10, %v744_v1, 0 }
 0x199   : > { %v2143_v41 = vpop.eup %2142  ;;  %v2447_v48 = vmul.f32 %v2141_v40, %v676_v54 }
 0x19a   : > { %v2145_v43 = vpop.eup %2144  ;;  %v2445_v47 = vmul.f32 %v2143_v41, %v682_v7 }
 0x19b   : > { %v2147_v49 = vpop.eup %2146  ;;  %v2455_v56 = vmul.f32 %v2145_v43, %v2433_v51  ;;  %v742_v50 = vpack.c.bf16 %v2439_v42, %v2447_v48  ;;  %v2108_v51 = vld [vmem:[%s3101_s7] sm:$0xff]  }
 0x19c   : > { %v743_v53 = vpack.c.bf16 %v2445_v47, %v2443_v46  ;;  %v2462_v54 = vmul.f32 %v2147_v49, %v2435_v55  ;;  %v2111_v55 = vld [vmem:[%s3102_s8] sm:$0xff]  }
 0x19e   : > { %778 = vmatprep.subr.bf16.mxu1 %v743_v53  ;;  %v740_v45 = vpack.c.bf16 %v2455_v56, %v2462_v54 }
 0x19f   : > { %779 = vmatpush1.bf16.msra.mxu1 %v742_v50 }
 0x1a0   : > { %780 = vmatprep.subr.bf16.mxu1 %v741_v57 }
 0x1a3   : > { %781 = vmatpush1.bf16.msra.mxu1 %v740_v45 }
 0x1a4   : > { %2070 = vmatprep.subr.bf16.mxu1 %v2175_v63 }
 0x1a6   : > { %2025 = vmatmul.mubr.msk.bf16.vlgmr.msra.gmra.mxu1 %vm759_vm10, %v2108_v51 }
 0x1a7   : > { %808 = vmatprep.mubr.bf16.mxu1 %v3106_v2  ;;  %2071 = vmatpush3.bf16.msra.mxu1 %v2110_v62 }
 0x1a8   : > { %2072 = vmatprep.subr.bf16.mxu1 %v2175_v63 }
 0x1ab   : > { %2073 = vmatpush3.bf16.msra.mxu1 %v2111_v55 }
 0x1ac   : > { %2084 = vmatprep.subr.msk.bf16.mxu1 %vm759_vm10, %v744_v1 }
 0x1ae   : > { %2026 = vmatmul.mubr.msk.bf16.gmra.mxu1 %vm759_vm10, %v2109_v0 }
 0x1af   : > { %2074 = vmatprep.mubr.msk.bf16.mxu1 %vm2176_vm11, %v2175_v63 }
 0x1b6   : > { %2075 = vmatmul.mubr.msk.bf16.vlgmr.msra.gmra.mxu1 %vm759_vm10, %v744_v1 }
 0x1b7   : > { %2079 = vmatpush3.bf16.xpose.msra.mxu1 %v836_v3  ;;  %2080 = vmatprep.mubr.msk.bf16.mxu1 %vm759_vm10, %v2112_v4 }
 0x1be   : > { %2081 = vmatmul.mubr.msk.bf16.vlgmr.msra.gmra.mxu1 %vm759_vm10, %v2113_v5 }
 0x1bf   : > { %1079 = vmatprep.mubr.bf16.mxu1 %v3106_v2 }
 0x266   : > { %v800_v6 = vpop.f32.mrf.mxu1 }
 0x268   : > { %v802_v7 = vpop.f32.mrf.mxu1 }
 0x26a   : > { %v804_v10 = vpop.f32.mrf.mxu1 }
 0x26b   : > { %v948_v30 = vpack.c.bf16 %v804_v10, %v800_v6 }
 0x26c   : > { %v806_v11 = vpop.f32.mrf.mxu1 }
 0x26d   : > { %v949_v27 = vpack.c.bf16 %v806_v11, %v802_v7 }
 0x26e   : > { %v810_v12 = vpop.f32.mrf.mxu1 }
 0x270   : > { %v812_v14 = vpop.f32.mrf.mxu1 }
 0x272   : > { %v814_v16 = vpop.f32.mrf.mxu1 }
 0x273   : > { %v950_v24 = vpack.c.bf16 %v814_v16, %v810_v12 }
 0x274   : > { %v816_v17 = vpop.f32.mrf.mxu1 }
 0x275   : > { %v951_v19 = vpack.c.bf16 %v816_v17, %v812_v14 }
 0x276   : > { %v872_v26 = vpop.f32.mrf.mxu1 }
 0x277   : > { %967 = vmatprep.subr.bf16.mxu0 %v951_v19  ;;  %v947_v13 = vpack.c.bf16 %v872_v26, %v872_v26 }
 0x278   : > { %v2076_v29 = vpop.f32.mrf.mxu1  ;;  %968 = vmatpush1.bf16.msra.mxu0 %v950_v24 }
 0x279   : > { %969 = vmatprep.subr.bf16.mxu0 %v949_v27 }
 0x27a   : > { %v875_v31 = vpop.f32.mrf.mxu1 }
 0x27c   : > { %v2077_v15 = vpop.f32.mrf.mxu1  ;;  %970 = vmatpush1.bf16.msra.mxu0 %v948_v30 }
 0x27e   : > { %v2082_v27 = vpop.f32.mrf.mxu1 }
 0x27f   : > { %2034 = vmatmul.mubr.msk.bf16.vlgmr.msra.gmra.mxu0 %vm759_vm10, %v947_v13 }
 0x280   : > { %1156 = vmatprep.mubr.bf16.mxu0 %v3106_v2  ;;  %v932_v29 = vpop.f32.mrf.mxu1 }
 0x282   : > { %v2083_v15 = vpop.f32.mrf.mxu1 }
 0x33f   : > { %v989_v32 = vpop.f32.mrf.mxu0 }
 0x340   : > { %v996_v33 = vrot.slane %v989_v32, 4 }
 0x341   : > { %v991_v34 = vpop.f32.mrf.mxu0 }
 0x342   : > { %v997_v36 = vmax.f32 %v989_v32, %v996_v33  ;;  %v1002_v37 = vrot.slane %v991_v34, 4 }
 0x343   : > { %v993_v38 = vpop.f32.mrf.mxu0 }
 0x344   : > { %v998_v40 = vrot.slane %v997_v36, 2  ;;  %v1003_v41 = vmax.f32 %v991_v34, %v1002_v37 }
 0x345   : > { %v994_v43 = vpop.f32.mrf.mxu0 }
 0x346   : > { %v999_v49 = vmax.f32 %v997_v36, %v998_v40  ;;  %v1004_v53 = vrot.slane %v1003_v41, 2  ;;  %v935_v36 = vpop.f32.mrf.mxu1  ;;  %v1033_v40 = vpack.c.bf16 %v2083_v15, %v2082_v27  ;;  %v1904_v27 = vld [vmem:[%s3099_s5] sm:$0xf] }
 0x347   : > { %v1032_v38 = vpack.c.bf16 %v935_v36, %v932_v29 }
 0x348   : > { %v1000_v50 = vrot.slane %v999_v49, 1  ;;  %v1005_v57 = vmax.f32 %v1003_v41, %v1004_v53 }
 0x34a   : > { %v1001_v45 = vmax.f32 %v999_v49, %v1000_v50  ;;  %v1006_v51 = vrot.slane %v1005_v57, 1 }
 0x34c   : > { %v1008_v62 = vsub.f32 %v989_v32, %v1001_v45  ;;  %v1007_v63 = vmax.f32 %v1005_v57, %v1006_v51 }
 0x34e   : > { %v1010_v55 = vmul.f32 1.442695, %v1008_v62  ;;  %v1009_v0 = vsub.f32 %v991_v34, %v1007_v63 }
 0x350   : > { %2148 = vpow2.f32 %v1010_v55  ;;  %v1012_v1 = vmul.f32 1.442695, %v1009_v0 }
 0x352   : > { %2150 = vpow2.f32 %v1012_v1  ;;  %v2114_v1 = vld [vmem:[%s3104_s10] sm:$0xff]  }
 0x35d   : > { %v2149_v3 = vpop.eup %2148 }
 0x35e   : > { %v1014_v4 = vrot.slane %v2149_v3, 4 }
 0x35f   : > { %v2151_v5 = vpop.eup %2150 }
 0x360   : > { %v1020_v6 = vrot.slane %v2151_v5, 4  ;;  %v1015_v7 = vadd.f32 %v2149_v3, %v1014_v4 }
 0x362   : > { %v1021_v10 = vadd.f32 %v2151_v5, %v1020_v6  ;;  %v1016_v11 = vrot.slane %v1015_v7, 2 }
 0x364   : > { %v1022_v12 = vrot.slane %v1021_v10, 2  ;;  %v1017_v14 = vadd.f32 %v1016_v11, %v1015_v7 }
 0x366   : > { %v1023_v16 = vadd.f32 %v1022_v12, %v1021_v10  ;;  %v1018_v17 = vrot.slane %v1017_v14, 1 }
 0x368   : > { %v1024_v19 = vrot.slane %v1023_v16, 1  ;;  %v1019_v24 = vadd.f32 %v1018_v17, %v1017_v14 }
 0x36a   : > { %v1025_v26 = vadd.f32 %v1024_v19, %v1023_v16  ;;  %2152 = vrcp.f32 %v1019_v24 }
 0x36c   : > { %2154 = vrcp.f32 %v1025_v26 }
 0x377   : > { %v2153_v30 = vpop.eup %2152 }
 0x378   : > { %v1028_v31 = vmul.f32 %v2153_v30, %v2149_v3  ;;  %v2115_v3 = vld [vmem:[%s3104_s10 + $0x8] sm:$0xff]  }
 0x379   : > { %v2155_v13 = vpop.eup %2154 }
 0x37a   : > { %v1029_v32 = vmul.f32 %v2155_v13, %v2151_v5  ;;  %v1030_v33 = vpack.c.bf16 %v1028_v31, %v1028_v31 }
 0x37c   : > { %v1031_v34 = vpack.c.bf16 %v1029_v32, %v1029_v32  ;;  %v1042_v37 = vsel %vm624_vm3, %v1030_v33, 0 }
 0x37e   : > { %2035 = vmatprep.subr.msk.bf16.mxu1 %vm624_vm3, %v1031_v34 }
 0x37f   : > { %1062 = vmatpush1.bf16.msra.mxu1 %v1042_v37 }
 0x382   : > { %2036 = vmatmul.mubr.msk.bf16.vlgmr.msra.gmra.mxu1 %vm1034_vm12, %v1032_v38 }
 0x383   : > { %1089 = vmatprep.mubr.bf16.mxu1 %v3106_v2 }
 0x38a   : > { %2037 = vmatmul.mubr.msk.bf16.gmra.mxu1 %vm1034_vm12, %v1033_v40 }
 0x38b   : > { %1295 = vmatprep.mubr.bf16.mxu1 %v3106_v2 }
 0x442   : > { %v1081_v41 = vpop.f32.mrf.mxu1 }
 0x444   : > { %v1083_v43 = vpop.f32.mrf.mxu1 }
 0x446   : > { %v1085_v49 = vpop.f32.mrf.mxu1 }
 0x447   : > { %v1104_v0 = vpack.c.bf16 %v1085_v49, %v1081_v41 }
 0x448   : > { %v1087_v53 = vpop.f32.mrf.mxu1 }
 0x449   : > { %v1105_v55 = vpack.c.bf16 %v1087_v53, %v1083_v43 }
 0x44a   : > { %v1091_v50 = vpop.f32.mrf.mxu1 }
 0x44c   : > { %v1093_v57 = vpop.f32.mrf.mxu1 }
 0x44e   : > { %v1095_v45 = vpop.f32.mrf.mxu1 }
 0x44f   : > { %v1106_v63 = vpack.c.bf16 %v1095_v45, %v1091_v50 }
 0x450   : > { %v1097_v51 = vpop.f32.mrf.mxu1 }
 0x451   : > { %v1107_v62 = vpack.c.bf16 %v1097_v51, %v1093_v57 }
 0x453   : > { %1136 = vmatprep.subr.bf16.mxu0 %v1107_v62 }
 0x454   : > { %1137 = vmatpush1.bf16.msra.mxu0 %v1106_v63 }
 0x455   : > { %1138 = vmatprep.subr.bf16.mxu0 %v1105_v55 }
 0x458   : > { %1139 = vmatpush1.bf16.msra.mxu0 %v1104_v0 }
 0x45b   : > { %2040 = vmatmul.mubr.msk.bf16.vlgmr.msra.gmra.mxu0 %vm759_vm10, %v2114_v1 }
 0x45c   : > { %1166 = vmatprep.mubr.bf16.mxu0 %v3106_v2 }
 0x463   : > { %2041 = vmatmul.mubr.msk.bf16.gmra.mxu0 %vm759_vm10, %v2115_v3 }
 0x464   : > { %1339 = vmatprep.mubr.bf16.mxu0 %v3106_v2 }
 0x51b   : > { %v1158_v4 = vpop.f32.mrf.mxu0 }
 0x51c   : > { %v2514_v5 = vadd.f32 %v1158_v4, %v2462_v54 }
 0x51d   : > { %v1160_v6 = vpop.f32.mrf.mxu0 }
 0x51e   : > { %1222 = vrot.lane.b32.xlu1 %v2514_v5, %s2174_s30 }
 0x51f   : > { %v1162_v7 = vpop.f32.mrf.mxu0 }
 0x520   : > { %v2519_v10 = vadd.f32 %v1162_v7, %v2455_v56  ;;  %v2546_v56 = vadd.f32 %v1160_v6, %v2450_v52 }
 0x521   : > { %v1164_v54 = vpop.f32.mrf.mxu0 }
 0x522   : > { %1185 = vrot.lane.b32.xlu1 %v2514_v5, %s2173_s29  ;;  %1224 = vrot.lane.b32.xlu0 %v2519_v10, %s2174_s30  ;;  %v2553_v11 = vadd.f32 %v1164_v54, %v2441_v44 }
 0x523   : > { %v1168_v44 = vpop.f32.mrf.mxu0 }
 0x524   : > { %v2580_v12 = vadd.f32 %v1168_v44, %v2447_v48 }
 0x525   : > { %v1170_v52 = vpop.f32.mrf.mxu0 }
 0x526   : > { %1348 = vrot.lane.b32.xlu1 %v2514_v5, %s2170_s27  ;;  %1187 = vrot.lane.b32.xlu0 %v2519_v10, %s2173_s29 }
 0x527   : > { %v1172_v14 = vpop.f32.mrf.mxu0 }
 0x528   : > { %v2587_v16 = vadd.f32 %v1172_v14, %v2439_v42  ;;  %v2618_v42 = vadd.f32 %v1170_v52, %v2443_v46 }
 0x529   : > { %v1174_v48 = vpop.f32.mrf.mxu0 }
 0x52a   : > { %1432 = vrot.lane.b32.xlu1 %v2514_v5, %s2171_s28  ;;  %1350 = vrot.lane.b32.xlu0 %v2519_v10, %s2170_s27  ;;  %v2625_v17 = vadd.f32 %v1174_v48, %v2445_v47 }
 0x52e   : > { %1568 = vrot.lane.b32.xlu1 %v2514_v5, %s2169_s26  ;;  %1434 = vrot.lane.b32.xlu0 %v2519_v10, %s2171_s28 }
 0x532   : > { %1652 = vrot.lane.b32.xlu1 %v2514_v5, %s2166_s23  ;;  %1570 = vrot.lane.b32.xlu0 %v2519_v10, %s2169_s26 }
 0x536   : > { %1736 = vrot.lane.b32.xlu1 %v2514_v5, %s2168_s25  ;;  %1654 = vrot.lane.b32.xlu0 %v2519_v10, %s2166_s23 }
 0x53a   : > { %1230 = vrot.lane.b32.xlu1 %v2546_v56, %s2174_s30  ;;  %1738 = vrot.lane.b32.xlu0 %v2519_v10, %s2168_s25 }
 0x53e   : > { %1193 = vrot.lane.b32.xlu1 %v2546_v56, %s2173_s29  ;;  %1232 = vrot.lane.b32.xlu0 %v2553_v11, %s2174_s30 }
 0x542   : > { %1356 = vrot.lane.b32.xlu1 %v2546_v56, %s2170_s27  ;;  %1195 = vrot.lane.b32.xlu0 %v2553_v11, %s2173_s29 }
 0x546   : > { %1440 = vrot.lane.b32.xlu1 %v2546_v56, %s2171_s28  ;;  %1358 = vrot.lane.b32.xlu0 %v2553_v11, %s2170_s27 }
 0x54a   : > { %1576 = vrot.lane.b32.xlu1 %v2546_v56, %s2169_s26  ;;  %1442 = vrot.lane.b32.xlu0 %v2553_v11, %s2171_s28 }
 0x54e   : > { %1660 = vrot.lane.b32.xlu1 %v2546_v56, %s2166_s23  ;;  %1578 = vrot.lane.b32.xlu0 %v2553_v11, %s2169_s26 }
 0x552   : > { %1744 = vrot.lane.b32.xlu1 %v2546_v56, %s2168_s25  ;;  %1662 = vrot.lane.b32.xlu0 %v2553_v11, %s2166_s23 }
 0x556   : > { %1746 = vrot.lane.b32.xlu0 %v2553_v11, %s2168_s25  ;;  %1226 = vrot.lane.b32.xlu1 %v2580_v12, %s2174_s30 }
 0x55a   : > { %1189 = vrot.lane.b32.xlu1 %v2580_v12, %s2173_s29  ;;  %1228 = vrot.lane.b32.xlu0 %v2587_v16, %s2174_s30 }
 0x55e   : > { %1352 = vrot.lane.b32.xlu1 %v2580_v12, %s2170_s27  ;;  %1191 = vrot.lane.b32.xlu0 %v2587_v16, %s2173_s29 }
 0x562   : > { %1436 = vrot.lane.b32.xlu1 %v2580_v12, %s2171_s28  ;;  %1354 = vrot.lane.b32.xlu0 %v2587_v16, %s2170_s27 }
 0x566   : > { %1572 = vrot.lane.b32.xlu1 %v2580_v12, %s2169_s26  ;;  %1438 = vrot.lane.b32.xlu0 %v2587_v16, %s2171_s28 }
 0x56a   : > { %1656 = vrot.lane.b32.xlu1 %v2580_v12, %s2166_s23  ;;  %1574 = vrot.lane.b32.xlu0 %v2587_v16, %s2169_s26 }
 0x56e   : > { %1740 = vrot.lane.b32.xlu1 %v2580_v12, %s2168_s25  ;;  %1658 = vrot.lane.b32.xlu0 %v2587_v16, %s2166_s23 }
 0x572   : > { %1824 = vrot.lane.b32.xlu1 %v2580_v12, %s2167_s24  ;;  %1742 = vrot.lane.b32.xlu0 %v2587_v16, %s2168_s25 }
 0x576   : > { %1234 = vrot.lane.b32.xlu1 %v2618_v42, %s2174_s30  ;;  %1826 = vrot.lane.b32.xlu0 %v2587_v16, %s2167_s24 }
 0x57a   : > { %1197 = vrot.lane.b32.xlu1 %v2618_v42, %s2173_s29  ;;  %1236 = vrot.lane.b32.xlu0 %v2625_v17, %s2174_s30  ;;  %s2063_s30 = sshll.u32 %s3180_s18, 3 }
 0x57b   : > { %s423_s15 = scalar_lea.vmem %s3105_s11, %s2063_s30 }
 0x57e   : > { %1360 = vrot.lane.b32.xlu1 %v2618_v42, %s2170_s27  ;;  %1199 = vrot.lane.b32.xlu0 %v2625_v17, %s2173_s29 }
 0x582   : > { %1444 = vrot.lane.b32.xlu1 %v2618_v42, %s2171_s28  ;;  %1362 = vrot.lane.b32.xlu0 %v2625_v17, %s2170_s27 }
 0x586   : > { %1820 = vrot.lane.b32.xlu1 %v2514_v5, %s2167_s24  ;;  %1446 = vrot.lane.b32.xlu0 %v2625_v17, %s2171_s28 }
 0x58a   : > { %1580 = vrot.lane.b32.xlu1 %v2618_v42, %s2169_s26  ;;  %1822 = vrot.lane.b32.xlu0 %v2519_v10, %s2167_s24 }
 0x58e   : > { %1664 = vrot.lane.b32.xlu1 %v2618_v42, %s2166_s23  ;;  %1582 = vrot.lane.b32.xlu0 %v2625_v17, %s2169_s26 }
 0x590   : > { %v1223_v46 = vpop.permute.xlu1 %1222 }
 0x592   : > { %1748 = vrot.lane.b32.xlu1 %v2618_v42, %s2168_s25  ;;  %1666 = vrot.lane.b32.xlu0 %v2625_v17, %s2166_s23 }
 0x594   : > { %v1186_v47 = vpop.permute.xlu1 %1185  ;;  %v1225_v19 = vpop.permute.xlu0 %1224 }
 0x596   : > { %1832 = vrot.lane.b32.xlu1 %v2618_v42, %s2167_s24  ;;  %1750 = vrot.lane.b32.xlu0 %v2625_v17, %s2168_s25 }
 0x598   : > { %v1349_v24 = vpop.permute.xlu1 %1348  ;;  %v1188_v26 = vpop.permute.xlu0 %1187 }
 0x59a   : > { %1828 = vrot.lane.b32.xlu1 %v2546_v56, %s2167_s24  ;;  %1834 = vrot.lane.b32.xlu0 %v2625_v17, %s2167_s24 }
 0x59c   : > { %v1433_v29 = vpop.permute.xlu1 %1432  ;;  %v1351_v30 = vpop.permute.xlu0 %1350 }
 0x59e   : > { %1907 = vperm.xlu1 %2105, %v1904_v27   ;;  %1830 = vrot.lane.b32.xlu0 %v2553_v11, %s2167_s24 }
 0x5a0   : > { %v1569_v31 = vpop.permute.xlu1 %1568  ;;  %v1435_v13 = vpop.permute.xlu0 %1434 }
 0x5a4   : > { %v1653_v15 = vpop.permute.xlu1 %1652  ;;  %v1571_v32 = vpop.permute.xlu0 %1570 }
 0x5a8   : > { %v2668_v33 = vpop.permute.xlu1 %1736  ;;  %v2670_v34 = vpop.permute.xlu0 %1654 }
 0x5ac   : > { %v1231_v36 = vpop.permute.xlu1 %1230  ;;  %v2672_v37 = vpop.permute.xlu0 %1738 }
 0x5ad   : > { %v1242_v38 = vsel %vm454_vm8, %v1231_v36, %v1223_v46  ;;  %v1238_v40 = vsel %vm454_vm8, %v1223_v46, %v1231_v36 }
 0x5ae   : > { %v2685_v57 = vmul.f32 %v1242_v38, %v2405_v8  ;;  %v2688_v45 = vmul.f32 %v1238_v40, %v2408_v23 }
 0x5b0   : > { %v1194_v41 = vpop.permute.xlu1 %1193  ;;  %v1233_v43 = vpop.permute.xlu0 %1232 }
 0x5b1   : > { %v1205_v49 = vsel %vm437_vm7, %v1194_v41, %v1186_v47  ;;  %v1239_v53 = vsel %vm454_vm8, %v1225_v19, %v1233_v43  ;;  %v1243_v50 = vsel %vm454_vm8, %v1233_v43, %v1225_v19  ;;  %v1201_v63 = vsel %vm437_vm7, %v1186_v47, %v1194_v41 }
 0x5b2   : > { %v2691_v51 = vmul.f32 %v1243_v50, %v2405_v8  ;;  %v2694_v62 = vmul.f32 %v1239_v53, %v2408_v23  ;;  %v2709_v54 = vmul.f32 %v1205_v49, %v2398_v20  ;;  %v2712_v44 = vmul.f32 %v1201_v63, %v2401_v21 }
 0x5b4   : > { %v1357_v0 = vpop.permute.xlu1 %1356  ;;  %v1196_v1 = vpop.permute.xlu0 %1195 }
 0x5b5   : > { %v1368_v4 = vsel %vm471_vm5, %v1357_v0, %v1349_v24  ;;  %v1202_v6 = vsel %vm437_vm7, %v1188_v26, %v1196_v1  ;;  %v1206_v7 = vsel %vm437_vm7, %v1196_v1, %v1188_v26  ;;  %v1364_v48 = vsel %vm471_vm5, %v1349_v24, %v1357_v0 }
 0x5b6   : > { %v2715_v52 = vmul.f32 %v1206_v7, %v2398_v20  ;;  %v2718_v14 = vmul.f32 %v1202_v6, %v2401_v21  ;;  %v2733_v40 = vmul.f32 %v1368_v4, %v2370_v58  ;;  %v2736_v24 = vmul.f32 %v1364_v48, %v2373_v59 }
 0x5b8   : > { %v1441_v47 = vpop.permute.xlu1 %1440  ;;  %v1359_v19 = vpop.permute.xlu0 %1358 }
 0x5b9   : > { %v1452_v27 = vsel %vm488_vm6, %v1441_v47, %v1433_v29  ;;  %v1365_v36 = vsel %vm471_vm5, %v1351_v30, %v1359_v19  ;;  %v1369_v38 = vsel %vm471_vm5, %v1359_v19, %v1351_v30  ;;  %v1448_v49 = vsel %vm488_vm6, %v1433_v29, %v1441_v47 }
 0x5ba   : > { %v2739_v41 = vmul.f32 %v1369_v38, %v2370_v58  ;;  %v2742_v43 = vmul.f32 %v1365_v36, %v2373_v59  ;;  %v2759_v6 = vmul.f32 %v1452_v27, %v2377_v60  ;;  %v2762_v7 = vmul.f32 %v1448_v49, %v2380_v61 }
 0x5bc   : > { %v1577_v50 = vpop.permute.xlu1 %1576  ;;  %v1443_v30 = vpop.permute.xlu0 %1442 }
 0x5bd   : > { %v1584_v0 = vsel %vm505_vm4, %v1569_v31, %v1577_v50  ;;  %v1588_v1 = vsel %vm505_vm4, %v1577_v50, %v1569_v31  ;;  %v1449_v4 = vsel %vm488_vm6, %v1435_v13, %v1443_v30  ;;  %v1453_v29 = vsel %vm488_vm6, %v1443_v30, %v1435_v13 }
 0x5be   : > { %v2765_v48 = vmul.f32 %v1453_v29, %v2377_v60  ;;  %v2768_v47 = vmul.f32 %v1449_v4, %v2380_v61  ;;  %v2783_v30 = vmul.f32 %v1584_v0, %v2343_v35  ;;  %v2786_v4 = vmul.f32 %v1588_v1, %v2351_v39 }
 0x5c0   : > { %v1661_v19 = vpop.permute.xlu1 %1660  ;;  %v1579_v36 = vpop.permute.xlu0 %1578  ;;  %3130 = vst [vmem:[#allocation4_spill] sm:$0xff] %v2783_v30  ;;  %3131 = vst [vmem:[#allocation5_spill] sm:$0xff] %v2786_v4 }
 0x5c1   : > { %v1668_v27 = vsel %vm522_vm1, %v1653_v15, %v1661_v19  ;;  %v1672_v38 = vsel %vm522_vm1, %v1661_v19, %v1653_v15  ;;  %v1585_v49 = vsel %vm505_vm4, %v1571_v32, %v1579_v36  ;;  %v1589_v50 = vsel %vm505_vm4, %v1579_v36, %v1571_v32 }
 0x5c2   : > { %v2789_v29 = vmul.f32 %v1585_v49, %v2343_v35  ;;  %v2792_v31 = vmul.f32 %v1589_v50, %v2351_v39  ;;  %v2811_v50 = vmul.f32 %v1668_v27, %v2320_v18  ;;  %v2814_v15 = vmul.f32 %v1672_v38, %v2325_v22 }
 0x5c4   : > { %3132 = vst [vmem:[#allocation6_spill] sm:$0xff] %v2789_v29  ;;  %3133 = vst [vmem:[#allocation7_spill] sm:$0xff] %v2792_v31  ;;  %v1745_v19 = vpop.permute.xlu1 %1744  ;;  %v1663_v13 = vpop.permute.xlu0 %1662 }
 0x5c5   : > { %v1752_v0 = vsel %vm539_vm2, %v2668_v33, %v1745_v19  ;;  %v1756_v1 = vsel %vm539_vm2, %v1745_v19, %v2668_v33  ;;  %v1669_v36 = vsel %vm522_vm1, %v2670_v34, %v1663_v13  ;;  %v1673_v49 = vsel %vm522_vm1, %v1663_v13, %v2670_v34  ;;  %3134 = vst [vmem:[#allocation8_spill] sm:$0xff] %v2811_v50 }
 0x5c6   : > { %3135 = vst [vmem:[#allocation9_spill] sm:$0xff] %v2814_v15  ;;  %v2817_v32 = vmul.f32 %v1669_v36, %v2320_v18  ;;  %v2820_v53 = vmul.f32 %v1673_v49, %v2325_v22  ;;  %v2833_v38 = vmul.f32 %v1752_v0, %v2332_v25  ;;  %v2836_v36 = vmul.f32 %v1756_v1, %v2337_v28 }
 0x5c8   : > { %3136 = vst [vmem:[#allocation10_spill] sm:$0xff] %v2817_v32  ;;  %3137 = vst [vmem:[#allocation11_spill] sm:$0xff] %v2820_v53  ;;  %v1747_v19 = vpop.permute.xlu0 %1746  ;;  %v1227_v2 = vpop.permute.xlu1 %1226 }
 0x5c9   : > { %v1753_v13 = vsel %vm539_vm2, %v2672_v37, %v1747_v19  ;;  %v1757_v27 = vsel %vm539_vm2, %v1747_v19, %v2672_v37  ;;  %3138 = vst [vmem:[#allocation12_spill] sm:$0xff] %v2833_v38  ;;  %3139 = vst [vmem:[#allocation13_spill] sm:$0xff] %v2836_v36 }
 0x5ca   : > { %v2839_v49 = vmul.f32 %v1753_v13, %v2332_v25  ;;  %v2842_v33 = vmul.f32 %v1757_v27, %v2337_v28 }
 0x5cc   : > { %3140 = vst [vmem:[#allocation14_spill] sm:$0xff] %v2839_v49  ;;  %3141 = vst [vmem:[#allocation15_spill] sm:$0xff] %v2842_v33  ;;  %v1190_v63 = vpop.permute.xlu1 %1189  ;;  %v1229_v46 = vpop.permute.xlu0 %1228 }
 0x5d0   : > { %v1353_v19 = vpop.permute.xlu1 %1352  ;;  %v1192_v0 = vpop.permute.xlu0 %1191 }
 0x5d4   : > { %v1437_v26 = vpop.permute.xlu1 %1436  ;;  %v1355_v55 = vpop.permute.xlu0 %1354 }
 0x5d8   : > { %v2848_v1 = vpop.permute.xlu1 %1572  ;;  %v1439_v3 = vpop.permute.xlu0 %1438 }
 0x5dc   : > { %v2850_v13 = vpop.permute.xlu1 %1656  ;;  %v2852_v50 = vpop.permute.xlu0 %1574 }
 0x5e0   : > { %v2854_v27 = vpop.permute.xlu1 %1740  ;;  %v2856_v32 = vpop.permute.xlu0 %1658 }
 0x5e1   : > { %3142 = vst [vmem:[#allocation16_spill] sm:$0xff] %v2854_v27 }
 0x5e4   : > { %v2858_v34 = vpop.permute.xlu1 %1824  ;;  %v2860_v38 = vpop.permute.xlu0 %1742 }
 0x5e5   : > { %3143 = vst [vmem:[#allocation17_spill] sm:$0xff] %v2858_v34  ;;  %3144 = vst [vmem:[#allocation18_spill] sm:$0xff] %v2860_v38 }
 0x5e8   : > { %v1235_v37 = vpop.permute.xlu1 %1234  ;;  %v2862_v49 = vpop.permute.xlu0 %1826 }
 0x5e9   : > { %3145 = vst [vmem:[#allocation19_spill] sm:$0xff] %v2862_v49  ;;  %v1244_v36 = vsel %vm454_vm8, %v1235_v37, %v1227_v2  ;;  %v1240_v33 = vsel %vm454_vm8, %v1227_v2, %v1235_v37 }
 0x5ea   : > { %v1250_v30 = vmul.f32 %v1244_v36, %v2405_v8  ;;  %v1251_v28 = vmul.f32 %v1240_v33, %v2408_v23 }
 0x5ec   : > { %v1198_v15 = vpop.permute.xlu1 %1197  ;;  %v1237_v53 = vpop.permute.xlu0 %1236 }
 0x5ed   : > { %v1241_v29 = vsel %vm454_vm8, %v1229_v46, %v1237_v53  ;;  %v1245_v34 = vsel %vm454_vm8, %v1237_v53, %v1229_v46  ;;  %v1207_v49 = vsel %vm437_vm7, %v1198_v15, %v1190_v63  ;;  %v1203_v2 = vsel %vm437_vm7, %v1190_v63, %v1198_v15 }
 0x5ee   : > { %v1252_v25 = vmul.f32 %v1245_v34, %v2405_v8  ;;  %v1253_v38 = vmul.f32 %v1241_v29, %v2408_v23  ;;  %v1213_v27 = vmul.f32 %v1207_v49, %v2398_v20  ;;  %v1214_v33 = vmul.f32 %v1203_v2, %v2401_v21 }
 0x5ef   : > { %v3146_v29 = vpack.c.bf16 %v2694_v62, %v2688_v45 }
 0x5f0   : > { %v1256_v37 = vpack.c.bf16 %v1252_v25, %v1250_v30  ;;  %v1361_v36 = vpop.permute.xlu1 %1360  ;;  %v1200_v4 = vpop.permute.xlu0 %1199  ;;  %v1257_v31 = vpack.c.bf16 %v1253_v38, %v1251_v28 }
 0x5f1   : > { %v1204_v46 = vsel %vm437_vm7, %v1192_v0, %v1200_v4  ;;  %v1208_v53 = vsel %vm437_vm7, %v1200_v4, %v1192_v0  ;;  %v1370_v8 = vsel %vm471_vm5, %v1361_v36, %v1353_v19  ;;  %v1366_v28 = vsel %vm471_vm5, %v1353_v19, %v1361_v36 }
 0x5f2   : > { %v1215_v23 = vmul.f32 %v1208_v53, %v2398_v20  ;;  %v1216_v25 = vmul.f32 %v1204_v46, %v2401_v21  ;;  %1275 = vmatprep.subr.bf16.mxu1 %v1257_v31  ;;  %v1376_v34 = vmul.f32 %v1370_v8, %v2370_v58  ;;  %v1377_v31 = vmul.f32 %v1366_v28, %v2373_v59 }
 0x5f3   : > { %1276 = vmatpush1.bf16.msra.mxu1 %v1256_v37  ;;  %v3147_v19 = vpack.c.bf16 %v2691_v51, %v2685_v57  ;;  %v3151_v8 = vmov 0   ;;  %v1517_v28 = vpack.c.bf16 %v2553_v11, %v2546_v56  ;;  %v3154_v11 = vpack.c.bf16 %v2765_v48, %v2759_v6 }
 0x5f4   : > { %v1219_v63 = vpack.c.bf16 %v1215_v23, %v1213_v27  ;;  %v1445_v30 = vpop.permute.xlu1 %1444  ;;  %1277 = vmatprep.subr.bf16.mxu1 %v3146_v29  ;;  %v1363_v4 = vpop.permute.xlu0 %1362  ;;  %v1220_v15 = vpack.c.bf16 %v1216_v25, %v1214_v33  ;;  %v3150_v33 = vpack.c.bf16 %v2742_v43, %v2736_v24  ;;  %v3152_v43 = vpack.c.bf16 %v2739_v41, %v2733_v40  ;;  %v2045_v23 = vld [vmem:[%s3098_s4 + $0x4] sm:$0x3] }
 0x5f5   : > { %v1367_v20 = vsel %vm471_vm5, %v1355_v55, %v1363_v4  ;;  %v1371_v21 = vsel %vm471_vm5, %v1363_v4, %v1355_v55  ;;  %v1454_v38 = vsel %vm488_vm6, %v1445_v30, %v1437_v26  ;;  %v1450_v62 = vsel %vm488_vm6, %v1437_v26, %v1445_v30  ;;  %v2042_v55 = vld [vmem:[%s3098_s4 + $0x2] sm:$0x3] }
 0x5f6   : > { %v1378_v49 = vmul.f32 %v1371_v21, %v2370_v58  ;;  %v1379_v45 = vmul.f32 %v1367_v20, %v2373_v59  ;;  %1319 = vmatprep.subr.bf16.mxu0 %v1220_v15  ;;  %v3148_v58 = vpack.c.bf16 %v2718_v14, %v2712_v44  ;;  %v1460_v26 = vmul.f32 %v1454_v38, %v2377_v60  ;;  %v1221_v14 = vld [vmem:[%s3098_s4] sm:$0x3]  ;;  %v3155_v21 = vld [vmem:[#allocation16_spill] sm:$0xff] }
 0x5f7   : > { %1278 = vmatpush1.bf16.msra.mxu1 %v3147_v19  ;;  %1320 = vmatpush1.bf16.msra.mxu0 %v1219_v63  ;;  %v1461_v37 = vmul.f32 %v1450_v62, %v2380_v61  ;;  %v3149_v44 = vpack.c.bf16 %v2715_v52, %v2709_v54  ;;  %v1519_v54 = vpack.c.bf16 %v2625_v17, %v2618_v42  ;;  %v3159_v19 = vld [vmem:[#allocation18_spill] sm:$0xff] }
 0x5f8   : > { %v1382_v0 = vpack.c.bf16 %v1378_v49, %v1376_v34  ;;  %v2913_v27 = vpop.permute.xlu1 %1820  ;;  %1321 = vmatprep.subr.bf16.mxu0 %v3148_v58  ;;  %v1447_v59 = vpop.permute.xlu0 %1446  ;;  %v1383_v2 = vpack.c.bf16 %v1379_v45, %v1377_v31  ;;  %v3153_v42 = vpack.c.bf16 %v2768_v47, %v2762_v7  ;;  %v1518_v41 = vpack.c.bf16 %v2587_v16, %v2580_v12  ;;  %v3156_v49 = vld [vmem:[#allocation7_spill] sm:$0xff]  ;;  %v3157_v45 = vld [vmem:[#allocation5_spill] sm:$0xff]  ;;  %v3160_v58 = vld [vmem:[#allocation2_spill] sm:$0xff] }
 0x5f9   : > { %v1451_v57 = vsel %vm488_vm6, %v1439_v3, %v1447_v59  ;;  %v1455_v51 = vsel %vm488_vm6, %v1447_v59, %v1439_v3  ;;  %v1516_v48 = vpack.c.bf16 %v2519_v10, %v2514_v5  ;;  %v2049_v5 = vld [vmem:[%s3098_s4 + $0x8] sm:$0x3]  ;;  %v3158_v62 = vpack.c.bf16 %v3156_v49, %v3157_v45 }
 0x5fa   : > { %v1462_v36 = vmul.f32 %v1455_v51, %v2377_v60  ;;  %v1463_v46 = vmul.f32 %v1451_v57, %v2380_v61  ;;  %2043 = vmatmul.mubr.msk.bf16.vlgmr.msra.gmra.mxu1 %vm759_vm10, %v2042_v55  ;;  %1401 = vmatprep.subr.bf16.mxu1 %v1383_v2  ;;  %v3161_v2 = vld [vmem:[#allocation3_spill] sm:$0xff] }
 0x5fb   : > { %1322 = vmatpush1.bf16.msra.mxu0 %v3149_v44  ;;  %1402 = vmatpush1.bf16.msra.mxu1 %v1382_v0 }
 0x5fc   : > { %v1466_v53 = vpack.c.bf16 %v1462_v36, %v1460_v26  ;;  %v1581_v3 = vpop.permute.xlu1 %1580  ;;  %1403 = vmatprep.subr.bf16.mxu1 %v3150_v33  ;;  %v2936_v60 = vpop.permute.xlu0 %1822  ;;  %v1467_v61 = vpack.c.bf16 %v1463_v46, %v1461_v37  ;;  %1421 = vmatprep.mubr.bf16.mxu1 %v3151_v8  ;;  %v3162_v37 = vld [vmem:[#allocation17_spill] sm:$0xff] }
 0x5fd   : > { %v1586_v52 = vsel %vm505_vm4, %v2848_v1, %v1581_v3  ;;  %v1590_v24 = vsel %vm505_vm4, %v1581_v3, %v2848_v1 }
 0x5fe   : > { %2044 = vmatmul.mubr.msk.bf16.vlgmr.msra.gmra.mxu0 %vm759_vm10, %v1221_v14  ;;  %1485 = vmatprep.subr.bf16.mxu0 %v1467_v61  ;;  %v1596_v7 = vmul.f32 %v1586_v52, %v2343_v35  ;;  %v1597_v47 = vmul.f32 %v1590_v24, %v2351_v39  ;;  %v3163_v14 = vld [vmem:[#allocation6_spill] sm:$0xff]  ;;  %v3166_v24 = vld [vmem:[#allocation19_spill] sm:$0xff] }
 0x5ff   : > { %1404 = vmatpush1.bf16.msra.mxu1 %v3152_v43  ;;  %1486 = vmatpush1.bf16.msra.mxu0 %v1466_v53  ;;  %v3164_v53 = vld [vmem:[#allocation4_spill] sm:$0xff] }
 0x600   : > { %v1665_v25 = vpop.permute.xlu1 %1664  ;;  %1487 = vmatprep.subr.bf16.mxu0 %v3153_v42  ;;  %v1583_v17 = vpop.permute.xlu0 %1582  ;;  %1537 = vmatprep.subr.bf16.mxu1 %v1519_v54  ;;  %v3165_v3 = vpack.c.bf16 %v3163_v14, %v3164_v53  ;;  %v2051_v54 = vld [vmem:[%s3098_s4 + $0xa] sm:$0x3]  ;;  %v3168_v42 = vld [vmem:[#allocation9_spill] sm:$0xff] }
 0x601   : > { %v1587_v1 = vsel %vm505_vm4, %v2852_v50, %v1583_v17  ;;  %v1591_v40 = vsel %vm505_vm4, %v1583_v17, %v2852_v50  ;;  %1505 = vmatprep.mubr.bf16.mxu0 %v3151_v8  ;;  %v1670_v50 = vsel %vm522_vm1, %v2850_v13, %v1665_v25  ;;  %v1674_v56 = vsel %vm522_vm1, %v1665_v25, %v2850_v13  ;;  %v3167_v25 = vld [vmem:[#allocation11_spill] sm:$0xff] }
 0x602   : > { %v1598_v63 = vmul.f32 %v1587_v1, %v2343_v35  ;;  %v1599_v30 = vmul.f32 %v1591_v40, %v2351_v39  ;;  %2046 = vmatmul.mubr.msk.bf16.vlgmr.msra.gmra.mxu1 %vm759_vm10, %v2045_v23  ;;  %v2047_v35 = vld [vmem:[%s3098_s4 + $0x6] sm:$0x3]  ;;  %v1680_v4 = vmul.f32 %v1670_v50, %v2320_v18  ;;  %v1681_v15 = vmul.f32 %v1674_v56, %v2325_v22  ;;  %v2156_v1 = vld [vmem:[%s3095_s1 + $0x10] ss:$0 sm:$0xff] }
 0x603   : > { %1488 = vmatpush1.bf16.msra.mxu0 %v3154_v11  ;;  %1538 = vmatpush1.bf16.msra.mxu1 %v1518_v41  ;;  %v3169_v17 = vpack.c.bf16 %v3167_v25, %v3168_v42  ;;  %v2157_v41 = vld [vmem:[%s3095_s1 + $0x18] ss:$0 sm:$0xff]  ;;  %v3170_v56 = vld [vmem:[#allocation10_spill] sm:$0xff]  ;;  %v3171_v11 = vld [vmem:[#allocation8_spill] sm:$0xff] }
 0x604   : > { %v1602_v39 = vpack.c.bf16 %v1598_v63, %v1596_v7  ;;  %v1749_v12 = vpop.permute.xlu1 %1748  ;;  %v1667_v16 = vpop.permute.xlu0 %1666  ;;  %1539 = vmatprep.subr.bf16.mxu1 %v1517_v28  ;;  %v1603_v29 = vpack.c.bf16 %v1599_v30, %v1597_v47  ;;  %1557 = vmatprep.mubr.bf16.mxu1 %v3151_v8 }
 0x605   : > { %v1671_v13 = vsel %vm522_vm1, %v2856_v32, %v1667_v16  ;;  %v1675_v6 = vsel %vm522_vm1, %v1667_v16, %v2856_v32  ;;  %v1754_v31 = vsel %vm539_vm2, %v3155_v21, %v1749_v12  ;;  %v1758_v32 = vsel %vm539_vm2, %v1749_v12, %v3155_v21  ;;  %v2053_v12 = vld [vmem:[%s3098_s4 + $0xc] sm:$0x3] }
 0x606   : > { %v1682_v34 = vmul.f32 %v1671_v13, %v2320_v18  ;;  %v1683_v20 = vmul.f32 %v1675_v6, %v2325_v22  ;;  %2048 = vmatmul.mubr.msk.bf16.vlgmr.msra.gmra.mxu0 %vm759_vm10, %v2047_v35  ;;  %1621 = vmatprep.subr.bf16.mxu0 %v1603_v29  ;;  %v1764_v59 = vmul.f32 %v1754_v31, %v3160_v58  ;;  %v3173_v29 = vld [vmem:[#allocation15_spill] sm:$0xff]  ;;  %v3174_v13 = vld [vmem:[#allocation13_spill] sm:$0xff]  ;;  %v3176_v31 = vld [vmem:[#allocation14_spill] sm:$0xff] }
 0x607   : > { %1540 = vmatpush1.bf16.msra.mxu1 %v1516_v48  ;;  %1622 = vmatpush1.bf16.msra.mxu0 %v1602_v39  ;;  %v1765_v26 = vmul.f32 %v1758_v32, %v3161_v2  ;;  %v3172_v35 = vpack.c.bf16 %v3170_v56, %v3171_v11  ;;  %v3175_v6 = vpack.c.bf16 %v3173_v29, %v3174_v13  ;;  %v3177_v32 = vld [vmem:[#allocation12_spill] sm:$0xff] }
 0x608   : > { %v1686_v10 = vpack.c.bf16 %v1682_v34, %v1680_v4  ;;  %v1833_v18 = vpop.permute.xlu1 %1832  ;;  %v1751_v22 = vpop.permute.xlu0 %1750  ;;  %v1687_v38 = vpack.c.bf16 %v1683_v20, %v1681_v15  ;;  %1641 = vmatprep.mubr.bf16.mxu0 %v3151_v8  ;;  %1623 = vmatprep.subr.bf16.mxu0 %v3158_v62 }
 0x609   : > { %v1755_v55 = vsel %vm539_vm2, %v3159_v19, %v1751_v22  ;;  %v1759_v0 = vsel %vm539_vm2, %v1751_v22, %v3159_v19  ;;  %v1838_v36 = vsel %vm556_vm0, %v3162_v37, %v1833_v18  ;;  %v1842_v46 = vsel %vm556_vm0, %v1833_v18, %v3162_v37 }
 0x60a   : > { %v1766_v57 = vmul.f32 %v1755_v55, %v3160_v58  ;;  %v1767_v51 = vmul.f32 %v1759_v0, %v3161_v2  ;;  %2050 = vmatmul.mubr.msk.bf16.vlgmr.msra.gmra.mxu1 %vm759_vm10, %v2049_v5  ;;  %1705 = vmatprep.subr.bf16.mxu1 %v1687_v38  ;;  %v1848_v40 = vmul.f32 %v2156_v1, %v1838_v36 }
 0x60b   : > { %1725 = vmatprep.mubr.bf16.mxu1 %v3151_v8  ;;  %1624 = vmatpush1.bf16.msra.mxu0 %v3165_v3  ;;  %v1849_v28 = vmul.f32 %v2157_v41, %v1842_v46  ;;  %v3178_v5 = vpack.c.bf16 %v3176_v31, %v3177_v32 }
 0x60c   : > { %v1770_v44 = vpack.c.bf16 %v1766_v57, %v1764_v59  ;;  %1706 = vmatpush1.bf16.msra.mxu1 %v1686_v10  ;;  %v1829_v33 = vpop.permute.xlu1 %1828  ;;  %v1835_v61 = vpop.permute.xlu0 %1834  ;;  %v1771_v52 = vpack.c.bf16 %v1767_v51, %v1765_v26  ;;  %v2057_v10 = vld [vmem:[%s3098_s4 + $0x10] sm:$0x3] }
 0x60d   : > { %v1839_v43 = vsel %vm556_vm0, %v3166_v24, %v1835_v61  ;;  %v1843_v23 = vsel %vm556_vm0, %v1835_v61, %v3166_v24  ;;  %1707 = vmatprep.subr.bf16.mxu1 %v3169_v17  ;;  %v1836_v63 = vsel %vm556_vm0, %v2913_v27, %v1829_v33  ;;  %v1840_v30 = vsel %vm556_vm0, %v1829_v33, %v2913_v27 }
 0x60e   : > { %v1850_v7 = vmul.f32 %v2156_v1, %v1839_v43  ;;  %v1851_v47 = vmul.f32 %v2157_v41, %v1843_v23  ;;  %1789 = vmatprep.subr.bf16.mxu0 %v1771_v52  ;;  %2052 = vmatmul.mubr.msk.bf16.vlgmr.msra.gmra.mxu0 %vm759_vm10, %v2051_v54  ;;  %v1844_v4 = vmul.f32 %v2156_v1, %v1836_v63 }
 0x60f   : > { %1790 = vmatpush1.bf16.msra.mxu0 %v1770_v44  ;;  %1809 = vmatprep.mubr.bf16.mxu0 %v3151_v8  ;;  %v1845_v15 = vmul.f32 %v2157_v41, %v1840_v30 }
 0x610   : > { %v1854_v50 = vpack.c.bf16 %v1850_v7, %v1848_v40  ;;  %1708 = vmatpush1.bf16.msra.mxu1 %v3172_v35  ;;  %v1831_v39 = vpop.permute.xlu0 %1830  ;;  %v1855_v16 = vpack.c.bf16 %v1851_v47, %v1849_v28  ;;  %1791 = vmatprep.subr.bf16.mxu0 %v3175_v6 }
 0x611   : > { %v1837_v27 = vsel %vm556_vm0, %v2936_v60, %v1831_v39  ;;  %v1841_v48 = vsel %vm556_vm0, %v1831_v39, %v2936_v60 }
 0x612   : > { %v1846_v34 = vmul.f32 %v2156_v1, %v1837_v27  ;;  %v1847_v20 = vmul.f32 %v2157_v41, %v1841_v48  ;;  %1873 = vmatprep.subr.bf16.mxu1 %v1855_v16 }
 0x613   : > { %2054 = vmatmul.mubr.msk.bf16.vlgmr.msra.gmra.mxu1 %vm759_vm10, %v2053_v12  ;;  %1792 = vmatpush1.bf16.msra.mxu0 %v3178_v5 }
 0x614   : > { %v1852_v21 = vpack.c.bf16 %v1846_v34, %v1844_v4  ;;  %1874 = vmatpush1.bf16.msra.mxu1 %v1854_v50  ;;  %v1853_v60 = vpack.c.bf16 %v1847_v20, %v1845_v15  ;;  %1893 = vmatprep.mubr.bf16.mxu1 %v3151_v8 }
 0x616   : > { %1875 = vmatprep.subr.bf16.mxu1 %v1853_v60  ;;  %2056 = vmatmul.mubr.msk.bf16.vlgmr.msra.gmra.mxu0 %vm759_vm10, %v2055_v9 }
 0x618   : > { %1876 = vmatpush1.bf16.msra.mxu1 %v1852_v21 }
 0x619   : > { %v1908_v6 = vpop.permute.xlu1 %1907 }
 0x61b   : > { %2058 = vmatmul.mubr.msk.bf16.vlgmr.msra.gmra.mxu1 %vm759_vm10, %v2057_v10 }
 0x6ba   : > { %v1297_v18 = vpop.f32.mrf.mxu1 }
 0x6bc   : > { %v1299_v22 = vpop.f32.mrf.mxu1 }
 0x6be   : > { %v1301_v38 = vpop.f32.mrf.mxu1  ;;  %v1341_v49 = vpop.f32.mrf.mxu0 }
 0x6bf   : > { %v1342_v46 = vadd.f32 %v1341_v49, %v1297_v18 }
 0x6c0   : > { %v1302_v45 = vpop.f32.mrf.mxu1  ;;  %v1343_v62 = vpop.f32.mrf.mxu0 }
 0x6c1   : > { %v1344_v53 = vadd.f32 %v1343_v62, %v1299_v22 }
 0x6c2   : > { %v1345_v19 = vpop.f32.mrf.mxu0  ;;  %v1423_v55 = vpop.f32.mrf.mxu1 }
 0x6c3   : > { %v1430_v3 = vadd.f32 %v1423_v55, %v1342_v46 }
 0x6c4   : > { %v1346_v0 = vpop.f32.mrf.mxu0  ;;  %v1425_v8 = vpop.f32.mrf.mxu1 }
 0x6c5   : > { %v1431_v54 = vadd.f32 %v1425_v8, %v1344_v53 }
 0x6c6   : > { %v1427_v58 = vpop.f32.mrf.mxu1  ;;  %v1507_v59 = vpop.f32.mrf.mxu0 }
 0x6c7   : > { %v1514_v52 = vadd.f32 %v1507_v59, %v1430_v3 }
 0x6c8   : > { %v1428_v2 = vpop.f32.mrf.mxu1  ;;  %v1509_v26 = vpop.f32.mrf.mxu0 }
 0x6c9   : > { %v1515_v23 = vadd.f32 %v1509_v26, %v1431_v54 }
 0x6ca   : > { %v1511_v57 = vpop.f32.mrf.mxu0  ;;  %v1559_v51 = vpop.f32.mrf.mxu1 }
 0x6cb   : > { %v1566_v25 = vadd.f32 %v1559_v51, %v1514_v52 }
 0x6cc   : > { %v1512_v37 = vpop.f32.mrf.mxu0  ;;  %v1561_v36 = vpop.f32.mrf.mxu1 }
 0x6cd   : > { %v1567_v1 = vadd.f32 %v1561_v36, %v1515_v23 }
 0x6ce   : > { %v1563_v44 = vpop.f32.mrf.mxu1  ;;  %v1643_v14 = vpop.f32.mrf.mxu0 }
 0x6cf   : > { %v1650_v40 = vadd.f32 %v1643_v14, %v1566_v25 }
 0x6d0   : > { %v1564_v33 = vpop.f32.mrf.mxu1  ;;  %v1645_v61 = vpop.f32.mrf.mxu0 }
 0x6d1   : > { %v1651_v7 = vadd.f32 %v1645_v61, %v1567_v1 }
 0x6d2   : > { %v1647_v24 = vpop.f32.mrf.mxu0 }
 0x6d3   : > { %v1727_v43 = vpop.f32.mrf.mxu1 }
 0x6d4   : > { %v1648_v42 = vpop.f32.mrf.mxu0  ;;  %v1734_v47 = vadd.f32 %v1727_v43, %v1650_v40 }
 0x6d5   : > { %v1729_v17 = vpop.f32.mrf.mxu1 }
 0x6d6   : > { %v1811_v28 = vpop.f32.mrf.mxu0  ;;  %v1735_v50 = vadd.f32 %v1729_v17, %v1651_v7 }
 0x6d7   : > { %v1731_v41 = vpop.f32.mrf.mxu1  ;;  %v1818_v56 = vadd.f32 %v1811_v28, %v1734_v47 }
 0x6d8   : > { %v1813_v30 = vpop.f32.mrf.mxu0 }
 0x6d9   : > { %v1732_v63 = vpop.f32.mrf.mxu1  ;;  %v1819_v39 = vadd.f32 %v1813_v30, %v1735_v50 }
 0x6da   : > { %v1815_v35 = vpop.f32.mrf.mxu0 }
 0x6db   : > { %v1895_v11 = vpop.f32.mrf.mxu1 }
 0x6dc   : > { %v1902_v12 = vadd.f32 %v1895_v11, %v1818_v56  ;;  %v1816_v29 = vpop.f32.mrf.mxu0 }
 0x6dd   : > { %v1897_v16 = vpop.f32.mrf.mxu1 }
 0x6de   : > { %v1903_v13 = vadd.f32 %v1897_v16, %v1819_v39  ;;  %v1910_v48 = vadd.f32 %v1908_v6, %v1902_v12 }
 0x6df   : > { %v1899_v27 = vpop.f32.mrf.mxu1 }
 0x6e0   : > { %v1911_v4 = vadd.f32 %v1908_v6, %v1903_v13 }
 0x6e1   : > { %v1900_v15 = vpop.f32.mrf.mxu1 }
 0x6e2   : > { %v1914_v34 = vcombine.low %v1910_v48, %v1911_v4 }
 0x6e4   : > { %1916 = vst [vmem:[%s423_s15] sm:$0xff] %v1914_v34 }
 0x6e5 PF: > { %s21_s17 = sadd.s32 1, %s2164_s17  }
 0x6e6   : > { %p18_p4 = scmp.ge.s32.totalorder %s21_s17, 4  }
 0x6e8   :  { %20 = sbr.rel (!%p18_p4) target bundleno = 1 (0x1), region = 108 }

</bundles_post_ra>
